<compile_context>
chip_gen: v6e
topology: v6e:2x2x1
jax: 0.10.0
libtpu: 0.0.40
codegen_flags: <defaults>
</compile_context>

<pallas_src>
import functools
import math

import jax
import jax.numpy as jnp
from jax.experimental import pallas as pl
from jax.experimental.pallas import tpu as pltpu


def _layernorm(x, w, b, eps=1e-5):
    # fp32 layernorm (matches the LayerNorm subclass that upcasts to fp32)
    mu = jnp.mean(x, axis=-1, keepdims=True)
    var = jnp.mean((x - mu) ** 2, axis=-1, keepdims=True)
    return (x - mu) * jax.lax.rsqrt(var + eps) * w + b


# ---------------------------------------------------------------------------
# Whole transformer stack: grid = (batch_tiles, layers).
# o_ref is the resident activation carrier along the layer axis.
# ---------------------------------------------------------------------------
def stack_kernel(x_ref,
                 ln1w_ref, ln1b_ref, wqkv_ref, bqkv_ref, wo_ref, bo_ref,
                 ln2w_ref, ln2b_ref, wfc_ref, bfc_ref, wpj_ref, bpj_ref,
                 o_ref, *, n_head, head_dim):
    Bt, L, W = x_ref.shape
    layer = pl.program_id(1)

    # Layer 0 of each batch tile: seed the resident activation.  o_ref keeps
    # the same block index across the layer axis, so it lives in VMEM for the
    # whole stack and is written back to HBM only once per batch tile.
    @pl.when(layer == 0)
    def _():
        o_ref[...] = x_ref[...]

    x = o_ref[...].astype(jnp.float32).reshape(Bt * L, W)          # (Bt*L, W)

    # ---- ln_1 (fp32) + fused QKV projection (bf16 MXU, fp32 accumulate) ----
    h = _layernorm(x, ln1w_ref[0], ln1b_ref[0])
    qkv = jnp.dot(h.astype(wqkv_ref.dtype), wqkv_ref[0],
                  preferred_element_type=jnp.float32) + bqkv_ref[0]  # (Bt*L, 3W)
    # NOTE: 1/sqrt(head_dim) is already folded into the q columns / q bias.

    # causal mask generated in-kernel: 0 on/below diagonal, -inf above
    row = jax.lax.broadcasted_iota(jnp.int32, (L, L), 0)
    col = jax.lax.broadcasted_iota(jnp.int32, (L, L), 1)
    mask = jnp.where(col <= row, 0.0, -jnp.inf).astype(jnp.float32)

    # ---- per-head scores / softmax / PV (per-sample; batched over Bt) ----
    heads_out = []
    for hh in range(n_head):
        lo = hh * head_dim
        q = qkv[:, lo:lo + head_dim].reshape(Bt, L, head_dim)
        k = qkv[:, W + lo:W + lo + head_dim].reshape(Bt, L, head_dim)
        v = qkv[:, 2 * W + lo:2 * W + lo + head_dim].reshape(Bt, L, head_dim)

        s = jnp.einsum('bld,bmd->blm',
                       q.astype(jnp.bfloat16), k.astype(jnp.bfloat16),
                       preferred_element_type=jnp.float32)          # (Bt, L, L)
        s = s + mask[None]
        s = s - jnp.max(s, axis=-1, keepdims=True)
        p = jnp.exp(s)
        p = p * pl.reciprocal(jnp.sum(p, axis=-1, keepdims=True), approx=True)

        oh = jnp.einsum('blm,bmd->bld',
                        p.astype(jnp.bfloat16), v.astype(jnp.bfloat16),
                        preferred_element_type=jnp.float32)          # (Bt, L, Dh)
        heads_out.append(oh.reshape(Bt * L, head_dim))

    attn = jnp.concatenate(heads_out, axis=-1)                       # (Bt*L, W)
    attn = jnp.dot(attn.astype(wo_ref.dtype), wo_ref[0],
                   preferred_element_type=jnp.float32) + bo_ref[0]
    x = x + attn                                                     # residual 1

    # ---- ln_2 + MLP (c_fc -> QuickGELU -> c_proj) ----
    h2 = _layernorm(x, ln2w_ref[0], ln2b_ref[0])
    m = jnp.dot(h2.astype(wfc_ref.dtype), wfc_ref[0],
                preferred_element_type=jnp.float32) + bfc_ref[0]
    m = m * jax.nn.sigmoid(1.702 * m)                                # QuickGELU (fp32)
    m = jnp.dot(m.astype(wpj_ref.dtype), wpj_ref[0],
                preferred_element_type=jnp.float32) + bpj_ref[0]
    x = x + m                                                        # residual 2

    o_ref[...] = x.reshape(Bt, L, W).astype(o_ref.dtype)


def transformer_stack(x, stack, n_head):
    B, L, W = x.shape
    layers = stack["w_qkv"].shape[0]
    Dh = W // n_head

    # batch tile: fill the MXU M dimension (target Bt*L >= 256) and amortize
    # the ~0.35us per-grid-step overhead; Bt must divide B.
    target = max(1, -(-256 // L))          # ceil(256 / L)
    bt = min(B, target)
    while B % bt:
        bt -= 1

    weight_names = ["ln1_w", "ln1_b", "w_qkv", "b_qkv", "w_out", "b_out",
                    "ln2_w", "ln2_b", "w_fc", "b_fc", "w_pj", "b_pj"]
    args = [x] + [stack[n] for n in weight_names]

    def wspec(a):
        nd = a.ndim
        blk = (1,) + a.shape[1:]            # one layer's slab per grid step
        return pl.BlockSpec(blk, lambda b, l, _nd=nd: (l,) + (0,) * (_nd - 1))

    in_specs = [pl.BlockSpec((bt, L, W), lambda b, l: (b, 0, 0))]
    in_specs += [wspec(a) for a in args[1:]]

    return pl.pallas_call(
        functools.partial(stack_kernel, n_head=n_head, head_dim=Dh),
        out_shape=jax.ShapeDtypeStruct((B, L, W), x.dtype),
        grid=(B // bt, layers),
        in_specs=in_specs,
        out_specs=pl.BlockSpec((bt, L, W), lambda b, l: (b, 0, 0)),
        compiler_params=pltpu.CompilerParams(
            dimension_semantics=("parallel", "arbitrary"),
            vmem_limit_bytes=64 * 1024 * 1024),
    )(*args)


# ---------------------------------------------------------------------------
# Final LayerNorm + projection kernel (ln_final + @ projection)
# Whole (B, W) EOT slab in one dense matmul step (no M=1 matmuls).
# ---------------------------------------------------------------------------
def head_kernel(x_ref, lnw_ref, lnb_ref, proj_ref, o_ref):
    x = x_ref[...].astype(jnp.float32)                               # (B, W)
    h = _layernorm(x, lnw_ref[...], lnb_ref[...])
    o_ref[...] = jnp.dot(h.astype(proj_ref.dtype), proj_ref[...],
                         preferred_element_type=jnp.float32).astype(o_ref.dtype)


def final_head(x_eot, lnw, lnb, proj):
    B, W = x_eot.shape
    E = proj.shape[1]
    return pl.pallas_call(
        head_kernel,
        out_shape=jax.ShapeDtypeStruct((B, E), x_eot.dtype),
        grid=(1,),
        in_specs=[pl.BlockSpec((B, W), lambda i: (0, 0)),
                  pl.BlockSpec((1, W), lambda i: (0, 0)),
                  pl.BlockSpec((1, W), lambda i: (0, 0)),
                  pl.BlockSpec((W, E), lambda i: (0, 0))],
        out_specs=pl.BlockSpec((B, E), lambda i: (0, 0)),
        compiler_params=pltpu.CompilerParams(dimension_semantics=("arbitrary",)),
    )(x_eot, lnw, lnb, proj)


# ---------------------------------------------------------------------------
# Parameter init (matches shapes/stds of the PyTorch module) + kernel layout
# ---------------------------------------------------------------------------
def init_params(key, vocab, ctx, width, heads, layers, embed_dim):
    Dh = width // heads
    scale = 1.0 / math.sqrt(Dh)
    attn_std = width ** -0.5
    proj_std = width ** -0.5 * (2 * layers) ** -0.5
    fc_std = (2 * width) ** -0.5

    keys = jax.random.split(key, 3 + 4 * layers)
    params = {
        "token_emb": 0.02 * jax.random.normal(keys[0], (vocab, width), jnp.float32),
        "pos_emb": 0.01 * jax.random.normal(keys[1], (ctx, width), jnp.float32),
        # pre-cast projection to bf16 (MXU operand); accumulate stays fp32
        "projection": (attn_std *
                       jax.random.normal(keys[2], (width, embed_dim), jnp.float32)
                       ).astype(jnp.bfloat16),
        "ln_final_w": jnp.ones((1, width), jnp.float32),
        "ln_final_b": jnp.zeros((1, width), jnp.float32),
    }

    names = ("ln1_w", "ln1_b", "w_qkv", "b_qkv", "w_out", "b_out",
             "ln2_w", "ln2_b", "w_fc", "b_fc", "w_pj", "b_pj")
    per_layer = {n: [] for n in names}
    kidx = 3
    for _ in range(layers):
        k1, k2, k3, k4 = keys[kidx:kidx + 4]
        kidx += 4
        in_proj_w = attn_std * jax.random.normal(k1, (3 * width, width), jnp.float32)
        out_proj_w = proj_std * jax.random.normal(k2, (width, width), jnp.float32)
        fc_w = fc_std * jax.random.normal(k3, (4 * width, width), jnp.float32)
        cproj_w = proj_std * jax.random.normal(k4, (width, 4 * width), jnp.float32)
        # nn.MultiheadAttention in_proj_bias / out_proj.bias default to zeros
        in_proj_b = jnp.zeros((3 * width,), jnp.float32)
        out_proj_b = jnp.zeros((width,), jnp.float32)
        fc_b = jnp.zeros((4 * width,), jnp.float32)
        cproj_b = jnp.zeros((width,), jnp.float32)

        wq, wk, wv = (in_proj_w[:width], in_proj_w[width:2 * width],
                      in_proj_w[2 * width:])
        bq, bk, bv = (in_proj_b[:width], in_proj_b[width:2 * width],
                      in_proj_b[2 * width:])

        # fused, pre-transposed, bf16 weights; 1/sqrt(Dh) folded into q part
        w_qkv = jnp.concatenate([wq.T * scale, wk.T, wv.T], axis=1)   # (W, 3W)
        b_qkv = jnp.concatenate([bq * scale, bk, bv])[None]           # (1, 3W)

        per_layer["ln1_w"].append(jnp.ones((1, width), jnp.float32))
        per_layer["ln1_b"].append(jnp.zeros((1, width), jnp.float32))
        per_layer["w_qkv"].append(w_qkv.astype(jnp.bfloat16))
        per_layer["b_qkv"].append(b_qkv.astype(jnp.float32))
        per_layer["w_out"].append(out_proj_w.T.astype(jnp.bfloat16))  # (W, W)
        per_layer["b_out"].append(out_proj_b[None].astype(jnp.float32))
        per_layer["ln2_w"].append(jnp.ones((1, width), jnp.float32))
        per_layer["ln2_b"].append(jnp.zeros((1, width), jnp.float32))
        per_layer["w_fc"].append(fc_w.T.astype(jnp.bfloat16))         # (W, 4W)
        per_layer["b_fc"].append(fc_b[None].astype(jnp.float32))
        per_layer["w_pj"].append(cproj_w.T.astype(jnp.bfloat16))      # (4W, W)
        per_layer["b_pj"].append(cproj_b[None].astype(jnp.float32))

    # stack along a leading layer axis so the whole stack is one pallas_call
    params["stack"] = {n: jnp.stack(v, axis=0) for n, v in per_layer.items()}
    return params


# ---------------------------------------------------------------------------
# Full TextTransformer forward
# ---------------------------------------------------------------------------
def text_transformer_forward(text, params, heads):
    # token embedding gather + positional embedding (glue in plain JAX)
    x = jnp.take(params["token_emb"], text, axis=0) + params["pos_emb"][None]
    # transformer stack (all residual blocks in one Pallas kernel; activation
    # resident in VMEM across layers, per-layer weights pipelined)
    x = transformer_stack(x, params["stack"], heads)
    # EOT token gather: x[arange(B), text.argmax(-1)]  (assumes EOT has the
    # largest vocab id, as in CLIP's tokenizer)
    eot = jnp.argmax(text, axis=-1)
    x_eot = x[jnp.arange(text.shape[0]), eot]             # (B, W)
    # ln_final + @ projection (Pallas kernel; LN is per-token so gathering
    # before LN is equivalent to the reference order)
    return final_head(x_eot, params["ln_final_w"], params["ln_final_b"],
                      params["projection"])


# TODO(synk): the PyTorch block's `self.i > 10` PIL/cv2/matplotlib attention
# visualization branch is pure debug file I/O with no Pallas equivalent; omitted.

if __name__ == "__main__":
    embed_dim, vocab_size, context_length, width, heads, layers = 32, 64, 16, 64, 4, 2
    batch = 2

    key = jax.random.PRNGKey(0)
    pkey, tkey = jax.random.split(key)
    params = init_params(pkey, vocab_size, context_length, width, heads, layers,
                         embed_dim)
    text = jax.random.randint(tkey, (batch, context_length), 0, vocab_size,
                              dtype=jnp.int32)

    out = text_transformer_forward(text, params, heads)
    out = jax.block_until_ready(out)
    assert out.shape == (batch, embed_dim), out.shape
    assert bool(jnp.all(jnp.isfinite(out)))
    print("KERNEL_OK")
</pallas_src>

<mosaic_0001>
module attributes {stable_mosaic.version = 11 : i64} {
  func.func @stack_kernel(%arg0: i32, %arg1: i32, %arg2: memref<2x16x64xf32, #tpu.memory_space<vmem>>, %arg3: memref<1x1x64xf32, #tpu.memory_space<vmem>>, %arg4: memref<1x1x64xf32, #tpu.memory_space<vmem>>, %arg5: memref<1x64x192xbf16, #tpu.memory_space<vmem>>, %arg6: memref<1x1x192xf32, #tpu.memory_space<vmem>>, %arg7: memref<1x64x64xbf16, #tpu.memory_space<vmem>>, %arg8: memref<1x1x64xf32, #tpu.memory_space<vmem>>, %arg9: memref<1x1x64xf32, #tpu.memory_space<vmem>>, %arg10: memref<1x1x64xf32, #tpu.memory_space<vmem>>, %arg11: memref<1x64x256xbf16, #tpu.memory_space<vmem>>, %arg12: memref<1x1x256xf32, #tpu.memory_space<vmem>>, %arg13: memref<1x256x64xbf16, #tpu.memory_space<vmem>>, %arg14: memref<1x1x64xf32, #tpu.memory_space<vmem>>, %arg15: memref<2x16x64xf32, #tpu.memory_space<vmem>>) attributes {dimension_semantics = [#tpu.dimension_semantics<parallel>, #tpu.dimension_semantics<arbitrary>], iteration_bounds = array<i64: 1, 2>, scalar_prefetch = 0 : i64, scratch_operands = 0 : i64, tpu.core_type = #tpu.core_type<tc>, window_params = [{transform_indices = @transform_0, window_bounds = array<i64: 2, 16, 64>}, {transform_indices = @transform_1, window_bounds = array<i64: 1, 1, 64>}, {transform_indices = @transform_2, window_bounds = array<i64: 1, 1, 64>}, {transform_indices = @transform_3, window_bounds = array<i64: 1, 64, 192>}, {transform_indices = @transform_4, window_bounds = array<i64: 1, 1, 192>}, {transform_indices = @transform_5, window_bounds = array<i64: 1, 64, 64>}, {transform_indices = @transform_6, window_bounds = array<i64: 1, 1, 64>}, {transform_indices = @transform_7, window_bounds = array<i64: 1, 1, 64>}, {transform_indices = @transform_8, window_bounds = array<i64: 1, 1, 64>}, {transform_indices = @transform_9, window_bounds = array<i64: 1, 64, 256>}, {transform_indices = @transform_10, window_bounds = array<i64: 1, 1, 256>}, {transform_indices = @transform_11, window_bounds = array<i64: 1, 256, 64>}, {transform_indices = @transform_12, window_bounds = array<i64: 1, 1, 64>}, {transform_indices = @transform_13, window_bounds = array<i64: 2, 16, 64>}]} {
    %c0_i32 = arith.constant 0 : i32
    %0 = arith.cmpi eq, %arg1, %c0_i32 : i32
    %1 = arith.extui %0 : i1 to i32
    %c0_i32_0 = arith.constant 0 : i32
    %2 = arith.cmpi ne, %1, %c0_i32_0 : i32
    scf.if %2 {
      %c0_75 = arith.constant 0 : index
      %c0_76 = arith.constant 0 : index
      %c0_77 = arith.constant 0 : index
      %212 = vector.load %arg2[%c0_75, %c0_76, %c0_77] : memref<2x16x64xf32, #tpu.memory_space<vmem>>, vector<2x16x64xf32>
      %c0_78 = arith.constant 0 : index
      %c0_79 = arith.constant 0 : index
      %c0_80 = arith.constant 0 : index
      %213 = vector.load %arg15[%c0_78, %c0_79, %c0_80] : memref<2x16x64xf32, #tpu.memory_space<vmem>>, vector<2x16x64xf32>
      tpu.vector_store %arg15[%c0_78, %c0_79, %c0_80], %212 {strides = array<i32>} : memref<2x16x64xf32, #tpu.memory_space<vmem>>, vector<2x16x64xf32>,
    } else {
    }
    %c0 = arith.constant 0 : index
    %c0_1 = arith.constant 0 : index
    %c0_2 = arith.constant 0 : index
    %3 = vector.load %arg15[%c0, %c0_1, %c0_2] : memref<2x16x64xf32, #tpu.memory_space<vmem>>, vector<2x16x64xf32>
    %4 = vector.shape_cast %3 : vector<2x16x64xf32> to vector<32x64xf32>
    %c0_3 = arith.constant 0 : index
    %c0_4 = arith.constant 0 : index
    %c0_5 = arith.constant 0 : index
    %5 = vector.load %arg3[%c0_3, %c0_4, %c0_5] : memref<1x1x64xf32, #tpu.memory_space<vmem>>, vector<1x1x64xf32>
    %6 = vector.shape_cast %5 : vector<1x1x64xf32> to vector<1x64xf32>
    %c0_6 = arith.constant 0 : index
    %c0_7 = arith.constant 0 : index
    %c0_8 = arith.constant 0 : index
    %7 = vector.load %arg4[%c0_6, %c0_7, %c0_8] : memref<1x1x64xf32, #tpu.memory_space<vmem>>, vector<1x1x64xf32>
    %8 = vector.shape_cast %7 : vector<1x1x64xf32> to vector<1x64xf32>
    %cst = arith.constant dense<0.000000e+00> : vector<32xf32>
    %9 = vector.multi_reduction <add>, %4, %cst [1] : vector<32x64xf32> to vector<32xf32>
    %10 = vector.shape_cast %9 : vector<32xf32> to vector<32x1xf32>
    %cst_9 = arith.constant 6.400000e+01 : f32
    %11 = vector.broadcast %cst_9 : f32 to vector<32x1xf32>
    %12 = arith.divf %10, %11 : vector<32x1xf32>
    %13 = vector.broadcast %12 : vector<32x1xf32> to vector<32x64xf32>
    %14 = arith.subf %4, %13 : vector<32x64xf32>
    %15 = arith.mulf %14, %14 : vector<32x64xf32>
    %cst_10 = arith.constant dense<0.000000e+00> : vector<32xf32>
    %16 = vector.multi_reduction <add>, %15, %cst_10 [1] : vector<32x64xf32> to vector<32xf32>
    %17 = vector.shape_cast %16 : vector<32xf32> to vector<32x1xf32>
    %cst_11 = arith.constant 6.400000e+01 : f32
    %18 = vector.broadcast %cst_11 : f32 to vector<32x1xf32>
    %19 = arith.divf %17, %18 : vector<32x1xf32>
    %20 = vector.broadcast %12 : vector<32x1xf32> to vector<32x64xf32>
    %21 = arith.subf %4, %20 : vector<32x64xf32>
    %cst_12 = arith.constant 9.99999974E-6 : f32
    %22 = vector.broadcast %cst_12 : f32 to vector<32x1xf32>
    %23 = arith.addf %19, %22 : vector<32x1xf32>
    %24 = math.rsqrt %23 : vector<32x1xf32>
    %25 = vector.broadcast %24 : vector<32x1xf32> to vector<32x64xf32>
    %26 = arith.mulf %21, %25 : vector<32x64xf32>
    %27 = vector.broadcast %6 : vector<1x64xf32> to vector<32x64xf32>
    %28 = arith.mulf %26, %27 : vector<32x64xf32>
    %29 = vector.broadcast %8 : vector<1x64xf32> to vector<32x64xf32>
    %30 = arith.addf %28, %29 : vector<32x64xf32>
    %31 = arith.truncf %30 : vector<32x64xf32> to vector<32x64xbf16>
    %c0_13 = arith.constant 0 : index
    %c0_14 = arith.constant 0 : index
    %c0_15 = arith.constant 0 : index
    %32 = vector.load %arg5[%c0_13, %c0_14, %c0_15] : memref<1x64x192xbf16, #tpu.memory_space<vmem>>, vector<1x64x192xbf16>
    %33 = vector.shape_cast %32 : vector<1x64x192xbf16> to vector<64x192xbf16>
    %cst_16 = arith.constant dense<0.000000e+00> : vector<32x192xf32>
    %34 = tpu.matmul %31, %33, %cst_16 {dimension_numbers = #tpu.dot_dimension_numbers<[1], [0], [0], [1], [0, 0, 1, 1], [], []>} : vector<32x64xbf16>, vector<64x192xbf16>, vector<32x192xf32> -> vector<32x192xf32>
    %c0_17 = arith.constant 0 : index
    %c0_18 = arith.constant 0 : index
    %c0_19 = arith.constant 0 : index
    %35 = vector.load %arg6[%c0_17, %c0_18, %c0_19] : memref<1x1x192xf32, #tpu.memory_space<vmem>>, vector<1x1x192xf32>
    %36 = vector.shape_cast %35 : vector<1x1x192xf32> to vector<1x192xf32>
    %37 = vector.broadcast %36 : vector<1x192xf32> to vector<32x192xf32>
    %38 = arith.addf %34, %37 : vector<32x192xf32>
    %39 = tpu.iota {dimensions = array<i32: 0>} : vector<16x16xi32>
    %40 = tpu.iota {dimensions = array<i32: 1>} : vector<16x16xi32>
    %41 = arith.cmpi sle, %40, %39 : vector<16x16xi32>
    %cst_20 = arith.constant 0.000000e+00 : f32
    %cst_21 = arith.constant 0xFF800000 : f32
    %42 = vector.broadcast %cst_20 : f32 to vector<16x16xf32>
    %43 = vector.broadcast %cst_21 : f32 to vector<16x16xf32>
    %44 = arith.select %41, %42, %43 : vector<16x16xi1>, vector<16x16xf32>
    %45 = vector.extract_strided_slice %38 {offsets = [0, 0], sizes = [32, 16], strides = [1, 1]} : vector<32x192xf32> to vector<32x16xf32>
    %46 = vector.shape_cast %45 : vector<32x16xf32> to vector<2x16x16xf32>
    %47 = vector.extract_strided_slice %38 {offsets = [0, 64], sizes = [32, 16], strides = [1, 1]} : vector<32x192xf32> to vector<32x16xf32>
    %48 = vector.shape_cast %47 : vector<32x16xf32> to vector<2x16x16xf32>
    %49 = vector.extract_strided_slice %38 {offsets = [0, 128], sizes = [32, 16], strides = [1, 1]} : vector<32x192xf32> to vector<32x16xf32>
    %50 = vector.shape_cast %49 : vector<32x16xf32> to vector<2x16x16xf32>
    %51 = arith.truncf %46 : vector<2x16x16xf32> to vector<2x16x16xbf16>
    %52 = arith.truncf %48 : vector<2x16x16xf32> to vector<2x16x16xbf16>
    "tpu.trace_start"() <{level = 10 : i32, message = "bld,bmd->blm"}> : () -> ()
    %cst_22 = arith.constant dense<0.000000e+00> : vector<2x16x16xf32>
    %53 = tpu.matmul %51, %52, %cst_22 {dimension_numbers = #tpu.dot_dimension_numbers<[2], [2], [1], [1], [0, 0, 0, 1, 1, 1], [0], [0]>} : vector<2x16x16xbf16>, vector<2x16x16xbf16>, vector<2x16x16xf32> -> vector<2x16x16xf32>
    "tpu.trace_stop"() : () -> ()
    %54 = vector.shape_cast %44 : vector<16x16xf32> to vector<1x16x16xf32>
    %55 = vector.broadcast %54 : vector<1x16x16xf32> to vector<2x16x16xf32>
    %56 = arith.addf %53, %55 : vector<2x16x16xf32>
    %cst_23 = arith.constant dense<0xFF800000> : vector<2x16xf32>
    %57 = vector.multi_reduction <maximumf>, %56, %cst_23 [2] : vector<2x16x16xf32> to vector<2x16xf32>
    %58 = vector.shape_cast %57 : vector<2x16xf32> to vector<2x16x1xf32>
    %59 = vector.broadcast %58 : vector<2x16x1xf32> to vector<2x16x16xf32>
    %60 = arith.subf %56, %59 : vector<2x16x16xf32>
    %61 = math.exp %60 : vector<2x16x16xf32>
    %cst_24 = arith.constant dense<0.000000e+00> : vector<2x16xf32>
    %62 = vector.multi_reduction <add>, %61, %cst_24 [2] : vector<2x16x16xf32> to vector<2x16xf32>
    %63 = vector.shape_cast %62 : vector<2x16xf32> to vector<2x16x1xf32>
    %64 = tpu.reciprocal %63 {approx = true} : vector<2x16x1xf32> -> vector<2x16x1xf32>
    %65 = vector.broadcast %64 : vector<2x16x1xf32> to vector<2x16x16xf32>
    %66 = arith.mulf %61, %65 : vector<2x16x16xf32>
    %67 = arith.truncf %66 : vector<2x16x16xf32> to vector<2x16x16xbf16>
    %68 = arith.truncf %50 : vector<2x16x16xf32> to vector<2x16x16xbf16>
    "tpu.trace_start"() <{level = 10 : i32, message = "blm,bmd->bld"}> : () -> ()
    %cst_25 = arith.constant dense<0.000000e+00> : vector<2x16x16xf32>
    %69 = tpu.matmul %67, %68, %cst_25 {dimension_numbers = #tpu.dot_dimension_numbers<[2], [1], [1], [2], [0, 0, 0, 1, 1, 2], [0], [0]>} : vector<2x16x16xbf16>, vector<2x16x16xbf16>, vector<2x16x16xf32> -> vector<2x16x16xf32>
    "tpu.trace_stop"() : () -> ()
    %70 = vector.shape_cast %69 : vector<2x16x16xf32> to vector<32x16xf32>
    %71 = vector.extract_strided_slice %38 {offsets = [0, 16], sizes = [32, 16], strides = [1, 1]} : vector<32x192xf32> to vector<32x16xf32>
    %72 = vector.shape_cast %71 : vector<32x16xf32> to vector<2x16x16xf32>
    %73 = vector.extract_strided_slice %38 {offsets = [0, 80], sizes = [32, 16], strides = [1, 1]} : vector<32x192xf32> to vector<32x16xf32>
    %74 = vector.shape_cast %73 : vector<32x16xf32> to vector<2x16x16xf32>
    %75 = vector.extract_strided_slice %38 {offsets = [0, 144], sizes = [32, 16], strides = [1, 1]} : vector<32x192xf32> to vector<32x16xf32>
    %76 = vector.shape_cast %75 : vector<32x16xf32> to vector<2x16x16xf32>
    %77 = arith.truncf %72 : vector<2x16x16xf32> to vector<2x16x16xbf16>
    %78 = arith.truncf %74 : vector<2x16x16xf32> to vector<2x16x16xbf16>
    "tpu.trace_start"() <{level = 10 : i32, message = "bld,bmd->blm"}> : () -> ()
    %cst_26 = arith.constant dense<0.000000e+00> : vector<2x16x16xf32>
    %79 = tpu.matmul %77, %78, %cst_26 {dimension_numbers = #tpu.dot_dimension_numbers<[2], [2], [1], [1], [0, 0, 0, 1, 1, 1], [0], [0]>} : vector<2x16x16xbf16>, vector<2x16x16xbf16>, vector<2x16x16xf32> -> vector<2x16x16xf32>
    "tpu.trace_stop"() : () -> ()
    %80 = vector.shape_cast %44 : vector<16x16xf32> to vector<1x16x16xf32>
    %81 = vector.broadcast %80 : vector<1x16x16xf32> to vector<2x16x16xf32>
    %82 = arith.addf %79, %81 : vector<2x16x16xf32>
    %cst_27 = arith.constant dense<0xFF800000> : vector<2x16xf32>
    %83 = vector.multi_reduction <maximumf>, %82, %cst_27 [2] : vector<2x16x16xf32> to vector<2x16xf32>
    %84 = vector.shape_cast %83 : vector<2x16xf32> to vector<2x16x1xf32>
    %85 = vector.broadcast %84 : vector<2x16x1xf32> to vector<2x16x16xf32>
    %86 = arith.subf %82, %85 : vector<2x16x16xf32>
    %87 = math.exp %86 : vector<2x16x16xf32>
    %cst_28 = arith.constant dense<0.000000e+00> : vector<2x16xf32>
    %88 = vector.multi_reduction <add>, %87, %cst_28 [2] : vector<2x16x16xf32> to vector<2x16xf32>
    %89 = vector.shape_cast %88 : vector<2x16xf32> to vector<2x16x1xf32>
    %90 = tpu.reciprocal %89 {approx = true} : vector<2x16x1xf32> -> vector<2x16x1xf32>
    %91 = vector.broadcast %90 : vector<2x16x1xf32> to vector<2x16x16xf32>
    %92 = arith.mulf %87, %91 : vector<2x16x16xf32>
    %93 = arith.truncf %92 : vector<2x16x16xf32> to vector<2x16x16xbf16>
    %94 = arith.truncf %76 : vector<2x16x16xf32> to vector<2x16x16xbf16>
    "tpu.trace_start"() <{level = 10 : i32, message = "blm,bmd->bld"}> : () -> ()
    %cst_29 = arith.constant dense<0.000000e+00> : vector<2x16x16xf32>
    %95 = tpu.matmul %93, %94, %cst_29 {dimension_numbers = #tpu.dot_dimension_numbers<[2], [1], [1], [2], [0, 0, 0, 1, 1, 2], [0], [0]>} : vector<2x16x16xbf16>, vector<2x16x16xbf16>, vector<2x16x16xf32> -> vector<2x16x16xf32>
    "tpu.trace_stop"() : () -> ()
    %96 = vector.shape_cast %95 : vector<2x16x16xf32> to vector<32x16xf32>
    %97 = vector.extract_strided_slice %38 {offsets = [0, 32], sizes = [32, 16], strides = [1, 1]} : vector<32x192xf32> to vector<32x16xf32>
    %98 = vector.shape_cast %97 : vector<32x16xf32> to vector<2x16x16xf32>
    %99 = vector.extract_strided_slice %38 {offsets = [0, 96], sizes = [32, 16], strides = [1, 1]} : vector<32x192xf32> to vector<32x16xf32>
    %100 = vector.shape_cast %99 : vector<32x16xf32> to vector<2x16x16xf32>
    %101 = vector.extract_strided_slice %38 {offsets = [0, 160], sizes = [32, 16], strides = [1, 1]} : vector<32x192xf32> to vector<32x16xf32>
    %102 = vector.shape_cast %101 : vector<32x16xf32> to vector<2x16x16xf32>
    %103 = arith.truncf %98 : vector<2x16x16xf32> to vector<2x16x16xbf16>
    %104 = arith.truncf %100 : vector<2x16x16xf32> to vector<2x16x16xbf16>
    "tpu.trace_start"() <{level = 10 : i32, message = "bld,bmd->blm"}> : () -> ()
    %cst_30 = arith.constant dense<0.000000e+00> : vector<2x16x16xf32>
    %105 = tpu.matmul %103, %104, %cst_30 {dimension_numbers = #tpu.dot_dimension_numbers<[2], [2], [1], [1], [0, 0, 0, 1, 1, 1], [0], [0]>} : vector<2x16x16xbf16>, vector<2x16x16xbf16>, vector<2x16x16xf32> -> vector<2x16x16xf32>
    "tpu.trace_stop"() : () -> ()
    %106 = vector.shape_cast %44 : vector<16x16xf32> to vector<1x16x16xf32>
    %107 = vector.broadcast %106 : vector<1x16x16xf32> to vector<2x16x16xf32>
    %108 = arith.addf %105, %107 : vector<2x16x16xf32>
    %cst_31 = arith.constant dense<0xFF800000> : vector<2x16xf32>
    %109 = vector.multi_reduction <maximumf>, %108, %cst_31 [2] : vector<2x16x16xf32> to vector<2x16xf32>
    %110 = vector.shape_cast %109 : vector<2x16xf32> to vector<2x16x1xf32>
    %111 = vector.broadcast %110 : vector<2x16x1xf32> to vector<2x16x16xf32>
    %112 = arith.subf %108, %111 : vector<2x16x16xf32>
    %113 = math.exp %112 : vector<2x16x16xf32>
    %cst_32 = arith.constant dense<0.000000e+00> : vector<2x16xf32>
    %114 = vector.multi_reduction <add>, %113, %cst_32 [2] : vector<2x16x16xf32> to vector<2x16xf32>
    %115 = vector.shape_cast %114 : vector<2x16xf32> to vector<2x16x1xf32>
    %116 = tpu.reciprocal %115 {approx = true} : vector<2x16x1xf32> -> vector<2x16x1xf32>
    %117 = vector.broadcast %116 : vector<2x16x1xf32> to vector<2x16x16xf32>
    %118 = arith.mulf %113, %117 : vector<2x16x16xf32>
    %119 = arith.truncf %118 : vector<2x16x16xf32> to vector<2x16x16xbf16>
    %120 = arith.truncf %102 : vector<2x16x16xf32> to vector<2x16x16xbf16>
    "tpu.trace_start"() <{level = 10 : i32, message = "blm,bmd->bld"}> : () -> ()
    %cst_33 = arith.constant dense<0.000000e+00> : vector<2x16x16xf32>
    %121 = tpu.matmul %119, %120, %cst_33 {dimension_numbers = #tpu.dot_dimension_numbers<[2], [1], [1], [2], [0, 0, 0, 1, 1, 2], [0], [0]>} : vector<2x16x16xbf16>, vector<2x16x16xbf16>, vector<2x16x16xf32> -> vector<2x16x16xf32>
    "tpu.trace_stop"() : () -> ()
    %122 = vector.shape_cast %121 : vector<2x16x16xf32> to vector<32x16xf32>
    %123 = vector.extract_strided_slice %38 {offsets = [0, 48], sizes = [32, 16], strides = [1, 1]} : vector<32x192xf32> to vector<32x16xf32>
    %124 = vector.shape_cast %123 : vector<32x16xf32> to vector<2x16x16xf32>
    %125 = vector.extract_strided_slice %38 {offsets = [0, 112], sizes = [32, 16], strides = [1, 1]} : vector<32x192xf32> to vector<32x16xf32>
    %126 = vector.shape_cast %125 : vector<32x16xf32> to vector<2x16x16xf32>
    %127 = vector.extract_strided_slice %38 {offsets = [0, 176], sizes = [32, 16], strides = [1, 1]} : vector<32x192xf32> to vector<32x16xf32>
    %128 = vector.shape_cast %127 : vector<32x16xf32> to vector<2x16x16xf32>
    %129 = arith.truncf %124 : vector<2x16x16xf32> to vector<2x16x16xbf16>
    %130 = arith.truncf %126 : vector<2x16x16xf32> to vector<2x16x16xbf16>
    "tpu.trace_start"() <{level = 10 : i32, message = "bld,bmd->blm"}> : () -> ()
    %cst_34 = arith.constant dense<0.000000e+00> : vector<2x16x16xf32>
    %131 = tpu.matmul %129, %130, %cst_34 {dimension_numbers = #tpu.dot_dimension_numbers<[2], [2], [1], [1], [0, 0, 0, 1, 1, 1], [0], [0]>} : vector<2x16x16xbf16>, vector<2x16x16xbf16>, vector<2x16x16xf32> -> vector<2x16x16xf32>
    "tpu.trace_stop"() : () -> ()
    %132 = vector.shape_cast %44 : vector<16x16xf32> to vector<1x16x16xf32>
    %133 = vector.broadcast %132 : vector<1x16x16xf32> to vector<2x16x16xf32>
    %134 = arith.addf %131, %133 : vector<2x16x16xf32>
    %cst_35 = arith.constant dense<0xFF800000> : vector<2x16xf32>
    %135 = vector.multi_reduction <maximumf>, %134, %cst_35 [2] : vector<2x16x16xf32> to vector<2x16xf32>
    %136 = vector.shape_cast %135 : vector<2x16xf32> to vector<2x16x1xf32>
    %137 = vector.broadcast %136 : vector<2x16x1xf32> to vector<2x16x16xf32>
    %138 = arith.subf %134, %137 : vector<2x16x16xf32>
    %139 = math.exp %138 : vector<2x16x16xf32>
    %cst_36 = arith.constant dense<0.000000e+00> : vector<2x16xf32>
    %140 = vector.multi_reduction <add>, %139, %cst_36 [2] : vector<2x16x16xf32> to vector<2x16xf32>
    %141 = vector.shape_cast %140 : vector<2x16xf32> to vector<2x16x1xf32>
    %142 = tpu.reciprocal %141 {approx = true} : vector<2x16x1xf32> -> vector<2x16x1xf32>
    %143 = vector.broadcast %142 : vector<2x16x1xf32> to vector<2x16x16xf32>
    %144 = arith.mulf %139, %143 : vector<2x16x16xf32>
    %145 = arith.truncf %144 : vector<2x16x16xf32> to vector<2x16x16xbf16>
    %146 = arith.truncf %128 : vector<2x16x16xf32> to vector<2x16x16xbf16>
    "tpu.trace_start"() <{level = 10 : i32, message = "blm,bmd->bld"}> : () -> ()
    %cst_37 = arith.constant dense<0.000000e+00> : vector<2x16x16xf32>
    %147 = tpu.matmul %145, %146, %cst_37 {dimension_numbers = #tpu.dot_dimension_numbers<[2], [1], [1], [2], [0, 0, 0, 1, 1, 2], [0], [0]>} : vector<2x16x16xbf16>, vector<2x16x16xbf16>, vector<2x16x16xf32> -> vector<2x16x16xf32>
    "tpu.trace_stop"() : () -> ()
    %148 = vector.shape_cast %147 : vector<2x16x16xf32> to vector<32x16xf32>
    %149 = tpu.concatenate %70, %96, %122, %148 in 1 : vector<32x16xf32>, vector<32x16xf32>, vector<32x16xf32>, vector<32x16xf32> -> vector<32x64xf32>
    %150 = arith.truncf %149 : vector<32x64xf32> to vector<32x64xbf16>
    %c0_38 = arith.constant 0 : index
    %c0_39 = arith.constant 0 : index
    %c0_40 = arith.constant 0 : index
    %151 = vector.load %arg7[%c0_38, %c0_39, %c0_40] : memref<1x64x64xbf16, #tpu.memory_space<vmem>>, vector<1x64x64xbf16>
    %152 = vector.shape_cast %151 : vector<1x64x64xbf16> to vector<64x64xbf16>
    %cst_41 = arith.constant dense<0.000000e+00> : vector<32x64xf32>
    %153 = tpu.matmul %150, %152, %cst_41 {dimension_numbers = #tpu.dot_dimension_numbers<[1], [0], [0], [1], [0, 0, 1, 1], [], []>} : vector<32x64xbf16>, vector<64x64xbf16>, vector<32x64xf32> -> vector<32x64xf32>
    %c0_42 = arith.constant 0 : index
    %c0_43 = arith.constant 0 : index
    %c0_44 = arith.constant 0 : index
    %154 = vector.load %arg8[%c0_42, %c0_43, %c0_44] : memref<1x1x64xf32, #tpu.memory_space<vmem>>, vector<1x1x64xf32>
    %155 = vector.shape_cast %154 : vector<1x1x64xf32> to vector<1x64xf32>
    %156 = vector.broadcast %155 : vector<1x64xf32> to vector<32x64xf32>
    %157 = arith.addf %153, %156 : vector<32x64xf32>
    %158 = arith.addf %4, %157 : vector<32x64xf32>
    %c0_45 = arith.constant 0 : index
    %c0_46 = arith.constant 0 : index
    %c0_47 = arith.constant 0 : index
    %159 = vector.load %arg9[%c0_45, %c0_46, %c0_47] : memref<1x1x64xf32, #tpu.memory_space<vmem>>, vector<1x1x64xf32>
    %160 = vector.shape_cast %159 : vector<1x1x64xf32> to vector<1x64xf32>
    %c0_48 = arith.constant 0 : index
    %c0_49 = arith.constant 0 : index
    %c0_50 = arith.constant 0 : index
    %161 = vector.load %arg10[%c0_48, %c0_49, %c0_50] : memref<1x1x64xf32, #tpu.memory_space<vmem>>, vector<1x1x64xf32>
    %162 = vector.shape_cast %161 : vector<1x1x64xf32> to vector<1x64xf32>
    %cst_51 = arith.constant dense<0.000000e+00> : vector<32xf32>
    %163 = vector.multi_reduction <add>, %158, %cst_51 [1] : vector<32x64xf32> to vector<32xf32>
    %164 = vector.shape_cast %163 : vector<32xf32> to vector<32x1xf32>
    %cst_52 = arith.constant 6.400000e+01 : f32
    %165 = vector.broadcast %cst_52 : f32 to vector<32x1xf32>
    %166 = arith.divf %164, %165 : vector<32x1xf32>
    %167 = vector.broadcast %166 : vector<32x1xf32> to vector<32x64xf32>
    %168 = arith.subf %158, %167 : vector<32x64xf32>
    %169 = arith.mulf %168, %168 : vector<32x64xf32>
    %cst_53 = arith.constant dense<0.000000e+00> : vector<32xf32>
    %170 = vector.multi_reduction <add>, %169, %cst_53 [1] : vector<32x64xf32> to vector<32xf32>
    %171 = vector.shape_cast %170 : vector<32xf32> to vector<32x1xf32>
    %cst_54 = arith.constant 6.400000e+01 : f32
    %172 = vector.broadcast %cst_54 : f32 to vector<32x1xf32>
    %173 = arith.divf %171, %172 : vector<32x1xf32>
    %174 = vector.broadcast %166 : vector<32x1xf32> to vector<32x64xf32>
    %175 = arith.subf %158, %174 : vector<32x64xf32>
    %cst_55 = arith.constant 9.99999974E-6 : f32
    %176 = vector.broadcast %cst_55 : f32 to vector<32x1xf32>
    %177 = arith.addf %173, %176 : vector<32x1xf32>
    %178 = math.rsqrt %177 : vector<32x1xf32>
    %179 = vector.broadcast %178 : vector<32x1xf32> to vector<32x64xf32>
    %180 = arith.mulf %175, %179 : vector<32x64xf32>
    %181 = vector.broadcast %160 : vector<1x64xf32> to vector<32x64xf32>
    %182 = arith.mulf %180, %181 : vector<32x64xf32>
    %183 = vector.broadcast %162 : vector<1x64xf32> to vector<32x64xf32>
    %184 = arith.addf %182, %183 : vector<32x64xf32>
    %185 = arith.truncf %184 : vector<32x64xf32> to vector<32x64xbf16>
    %c0_56 = arith.constant 0 : index
    %c0_57 = arith.constant 0 : index
    %c0_58 = arith.constant 0 : index
    %186 = vector.load %arg11[%c0_56, %c0_57, %c0_58] : memref<1x64x256xbf16, #tpu.memory_space<vmem>>, vector<1x64x256xbf16>
    %187 = vector.shape_cast %186 : vector<1x64x256xbf16> to vector<64x256xbf16>
    %cst_59 = arith.constant dense<0.000000e+00> : vector<32x256xf32>
    %188 = tpu.matmul %185, %187, %cst_59 {dimension_numbers = #tpu.dot_dimension_numbers<[1], [0], [0], [1], [0, 0, 1, 1], [], []>} : vector<32x64xbf16>, vector<64x256xbf16>, vector<32x256xf32> -> vector<32x256xf32>
    %c0_60 = arith.constant 0 : index
    %c0_61 = arith.constant 0 : index
    %c0_62 = arith.constant 0 : index
    %189 = vector.load %arg12[%c0_60, %c0_61, %c0_62] : memref<1x1x256xf32, #tpu.memory_space<vmem>>, vector<1x1x256xf32>
    %190 = vector.shape_cast %189 : vector<1x1x256xf32> to vector<1x256xf32>
    %191 = vector.broadcast %190 : vector<1x256xf32> to vector<32x256xf32>
    %192 = arith.addf %188, %191 : vector<32x256xf32>
    %cst_63 = arith.constant 1.702000e+00 : f32
    %193 = vector.broadcast %cst_63 : f32 to vector<32x256xf32>
    %194 = arith.mulf %193, %192 : vector<32x256xf32>
    %195 = arith.negf %194 : vector<32x256xf32>
    %196 = math.exp %195 : vector<32x256xf32>
    %cst_64 = arith.constant 1.000000e+00 : f32
    %197 = vector.broadcast %cst_64 : f32 to vector<32x256xf32>
    %198 = arith.addf %197, %196 : vector<32x256xf32>
    %199 = arith.divf %197, %198 : vector<32x256xf32>
    %200 = arith.mulf %192, %199 : vector<32x256xf32>
    %201 = arith.truncf %200 : vector<32x256xf32> to vector<32x256xbf16>
    %c0_65 = arith.constant 0 : index
    %c0_66 = arith.constant 0 : index
    %c0_67 = arith.constant 0 : index
    %202 = vector.load %arg13[%c0_65, %c0_66, %c0_67] : memref<1x256x64xbf16, #tpu.memory_space<vmem>>, vector<1x256x64xbf16>
    %203 = vector.shape_cast %202 : vector<1x256x64xbf16> to vector<256x64xbf16>
    %cst_68 = arith.constant dense<0.000000e+00> : vector<32x64xf32>
    %204 = tpu.matmul %201, %203, %cst_68 {dimension_numbers = #tpu.dot_dimension_numbers<[1], [0], [0], [1], [0, 0, 1, 1], [], []>} : vector<32x256xbf16>, vector<256x64xbf16>, vector<32x64xf32> -> vector<32x64xf32>
    %c0_69 = arith.constant 0 : index
    %c0_70 = arith.constant 0 : index
    %c0_71 = arith.constant 0 : index
    %205 = vector.load %arg14[%c0_69, %c0_70, %c0_71] : memref<1x1x64xf32, #tpu.memory_space<vmem>>, vector<1x1x64xf32>
    %206 = vector.shape_cast %205 : vector<1x1x64xf32> to vector<1x64xf32>
    %207 = vector.broadcast %206 : vector<1x64xf32> to vector<32x64xf32>
    %208 = arith.addf %204, %207 : vector<32x64xf32>
    %209 = arith.addf %158, %208 : vector<32x64xf32>
    %210 = vector.shape_cast %209 : vector<32x64xf32> to vector<2x16x64xf32>
    %c0_72 = arith.constant 0 : index
    %c0_73 = arith.constant 0 : index
    %c0_74 = arith.constant 0 : index
    %211 = vector.load %arg15[%c0_72, %c0_73, %c0_74] : memref<2x16x64xf32, #tpu.memory_space<vmem>>, vector<2x16x64xf32>
    tpu.vector_store %arg15[%c0_72, %c0_73, %c0_74], %210 {strides = array<i32>} : memref<2x16x64xf32, #tpu.memory_space<vmem>>, vector<2x16x64xf32>,
    return
  }
  func.func @transform_0(%arg0: i32, %arg1: i32) -> (i32, i32, i32) {
    %c0_i32 = arith.constant 0 : i32
    %c0_i32_0 = arith.constant 0 : i32
    %c0_i32_1 = arith.constant 0 : i32
    return %arg0, %c0_i32, %c0_i32_0 : i32, i32, i32
  }
  func.func @transform_1(%arg0: i32, %arg1: i32) -> (i32, i32, i32) {
    %c0_i32 = arith.constant 0 : i32
    %c0_i32_0 = arith.constant 0 : i32
    %c0_i32_1 = arith.constant 0 : i32
    return %arg1, %c0_i32, %c0_i32_0 : i32, i32, i32
  }
  func.func @transform_2(%arg0: i32, %arg1: i32) -> (i32, i32, i32) {
    %c0_i32 = arith.constant 0 : i32
    %c0_i32_0 = arith.constant 0 : i32
    %c0_i32_1 = arith.constant 0 : i32
    return %arg1, %c0_i32, %c0_i32_0 : i32, i32, i32
  }
  func.func @transform_3(%arg0: i32, %arg1: i32) -> (i32, i32, i32) {
    %c0_i32 = arith.constant 0 : i32
    %c0_i32_0 = arith.constant 0 : i32
    %c0_i32_1 = arith.constant 0 : i32
    return %arg1, %c0_i32, %c0_i32_0 : i32, i32, i32
  }
  func.func @transform_4(%arg0: i32, %arg1: i32) -> (i32, i32, i32) {
    %c0_i32 = arith.constant 0 : i32
    %c0_i32_0 = arith.constant 0 : i32
    %c0_i32_1 = arith.constant 0 : i32
    return %arg1, %c0_i32, %c0_i32_0 : i32, i32, i32
  }
  func.func @transform_5(%arg0: i32, %arg1: i32) -> (i32, i32, i32) {
    %c0_i32 = arith.constant 0 : i32
    %c0_i32_0 = arith.constant 0 : i32
    %c0_i32_1 = arith.constant 0 : i32
    return %arg1, %c0_i32, %c0_i32_0 : i32, i32, i32
  }
  func.func @transform_6(%arg0: i32, %arg1: i32) -> (i32, i32, i32) {
    %c0_i32 = arith.constant 0 : i32
    %c0_i32_0 = arith.constant 0 : i32
    %c0_i32_1 = arith.constant 0 : i32
    return %arg1, %c0_i32, %c0_i32_0 : i32, i32, i32
  }
  func.func @transform_7(%arg0: i32, %arg1: i32) -> (i32, i32, i32) {
    %c0_i32 = arith.constant 0 : i32
    %c0_i32_0 = arith.constant 0 : i32
    %c0_i32_1 = arith.constant 0 : i32
    return %arg1, %c0_i32, %c0_i32_0 : i32, i32, i32
  }
  func.func @transform_8(%arg0: i32, %arg1: i32) -> (i32, i32, i32) {
    %c0_i32 = arith.constant 0 : i32
    %c0_i32_0 = arith.constant 0 : i32
    %c0_i32_1 = arith.constant 0 : i32
    return %arg1, %c0_i32, %c0_i32_0 : i32, i32, i32
  }
  func.func @transform_9(%arg0: i32, %arg1: i32) -> (i32, i32, i32) {
    %c0_i32 = arith.constant 0 : i32
    %c0_i32_0 = arith.constant 0 : i32
    %c0_i32_1 = arith.constant 0 : i32
    return %arg1, %c0_i32, %c0_i32_0 : i32, i32, i32
  }
  func.func @transform_10(%arg0: i32, %arg1: i32) -> (i32, i32, i32) {
    %c0_i32 = arith.constant 0 : i32
    %c0_i32_0 = arith.constant 0 : i32
    %c0_i32_1 = arith.constant 0 : i32
    return %arg1, %c0_i32, %c0_i32_0 : i32, i32, i32
  }
  func.func @transform_11(%arg0: i32, %arg1: i32) -> (i32, i32, i32) {
    %c0_i32 = arith.constant 0 : i32
    %c0_i32_0 = arith.constant 0 : i32
    %c0_i32_1 = arith.constant 0 : i32
    return %arg1, %c0_i32, %c0_i32_0 : i32, i32, i32
  }
  func.func @transform_12(%arg0: i32, %arg1: i32) -> (i32, i32, i32) {
    %c0_i32 = arith.constant 0 : i32
    %c0_i32_0 = arith.constant 0 : i32
    %c0_i32_1 = arith.constant 0 : i32
    return %arg1, %c0_i32, %c0_i32_0 : i32, i32, i32
  }
  func.func @transform_13(%arg0: i32, %arg1: i32) -> (i32, i32, i32) {
    %c0_i32 = arith.constant 0 : i32
    %c0_i32_0 = arith.constant 0 : i32
    %c0_i32_1 = arith.constant 0 : i32
    return %arg0, %c0_i32, %c0_i32_0 : i32, i32, i32
  }
}

</mosaic_0001>

<bundles_post_ra>
// kernel: tpu_custom_call.1
= control target key start
LH: loop header
LB: loop body
LE: loop exit
PB: predicated region body
PF: predicated region fallthrough
CT: control target
= control target key end

     0   :  { %s3781_s0 = inlined_call_operand.vmem [shape: f32[2,16,64], index: 0, kind: input, shape index: {}]   ;;  %s3782_s1 = inlined_call_operand.vmem [shape: f32[2,1,64], index: 1, kind: input, shape index: {}]   ;;  %s3783_s2 = inlined_call_operand.vmem [shape: f32[2,1,64], index: 2, kind: input, shape index: {}]   ;;  %s3784_s3 = inlined_call_operand.vmem [shape: bf16[2,64,192], index: 3, kind: input, shape index: {}]   ;;  %s3785_s4 = inlined_call_operand.vmem [shape: f32[2,1,192], index: 4, kind: input, shape index: {}]   ;;  %s3786_s5 = inlined_call_operand.vmem [shape: bf16[2,64,64], index: 5, kind: input, shape index: {}]   ;;  %s3787_s6 = inlined_call_operand.vmem [shape: f32[2,1,64], index: 6, kind: input, shape index: {}]   ;;  %s3788_s7 = inlined_call_operand.vmem [shape: f32[2,1,64], index: 7, kind: input, shape index: {}]   ;;  %s3789_s8 = inlined_call_operand.vmem [shape: f32[2,1,64], index: 8, kind: input, shape index: {}]   ;;  %s3790_s9 = inlined_call_operand.vmem [shape: bf16[2,64,256], index: 9, kind: input, shape index: {}]   ;;  %s3791_s10 = inlined_call_operand.vmem [shape: f32[2,1,256], index: 10, kind: input, shape index: {}]   ;;  %s3792_s11 = inlined_call_operand.vmem [shape: bf16[2,256,64], index: 11, kind: input, shape index: {}]   ;;  %s3793_s12 = inlined_call_operand.vmem [shape: f32[2,1,64], index: 12, kind: input, shape index: {}]   ;;  %s3794_s13 = inlined_call_operand.hbm [shape: f32[2,16,64], index: 13, kind: output, shape index: {}]  }
   0x1   :  { %3797 = sst [smem:[#allocation9_spill]] %s3783_s2 }
   0x2   :  { %3798 = sst [smem:[#allocation10_spill]] %s3784_s3 }
   0x3   :  { %3799 = sst [smem:[#allocation11_spill]] %s3785_s4 }
   0x4   :  { %3800 = sst [smem:[#allocation12_spill]] %s3794_s13 }
   0x5   :  { %18 = vsyncpa [#allocation3], 0  ;;  %s3288_s25 = smov 0   ;;  %s3290_s26 = smov 0  }
   0x6   :  { %s3292_s27 = smov 0  }
   0x7 LB: > { %3801 = sst [smem:[#allocation5_spill]] %s3198_s26  ;;  %s33_s29 = sadd.s32 1, %s3198_s26  ;;  %s3202_s27 = sphi %s3292_s27, %s24_s27   ;;  %s3198_s26 = sphi %s3290_s26, %s3820_s26   ;;  %s3194_s25 = sphi %s3288_s25, %s3819_s25  }
   0x8   : > { %3802 = sst [smem:[#allocation6_spill]] %s3202_s27  ;;  %p34_p0 = scmp.ge.s32.totalorder %s33_s29, 2 }
   0x9   : > { %p2652_p1 = scmp.ge.s32.totalorder %s3202_s27, 1  ;;  %p508_p2 = scmp.lt.s32.totalorder %s3202_s27, 3 }
   0xa   : > { %s3822_s29 = smov (%p34_p0, %s33_s29), 0 }
   0xb   : > { %3803 = sst [smem:[#allocation7_spill]] %s3822_s29  ;;  %p509_p3 = pnand %p2652_p1, %p508_p2 }
   0xd   : > { %512 = sbr.rel (%p509_p3) target bundleno = 4148 (0x1034), region = 72 }
  0x12   : > { %p601_p4 = scmp.lt.s32.totalorder %s3194_s25, 1  ;;  %s3805_s3 = sld [smem:[#allocation10_spill]] }
  0x13   : > { %s3806_s4 = sld [smem:[#allocation11_spill]]  ;;  %p2663_p5 = scmp.ne.s32.totalorder %s3194_s25, 0 }
  0x14   : > { %s3311_s30 = scalar_select %p601_p4, %s3194_s25, 1 }
  0x16   : > { %s2740_s20 = sshll.u32 %s3311_s30, 6  ;;  %s2655_s21 = sshll.u32 %s3311_s30, 1 }
  0x17   : > { %s2741_s29 = sshll.u32 %s3311_s30, 5  ;;  %s629_s14 = scalar_lea.vmem %s3789_s8, %s3311_s30 }
  0x18   : > { %s3326_s24 = scalar_lea.vmem %s3805_s3, %s2740_s20  ;;  %s3341_s18 = scalar_lea.vmem %s3786_s5, %s2741_s29 }
  0x19   : > { %s3331_s28 = scalar_lea.vmem %s3806_s4, %s2655_s21  ;;  %s3359_s16 = scalar_lea.vmem %s3791_s10, %s2655_s21 }
  0x1a   : > { %3807 = sst [smem:[#allocation8_spill]] %s3331_s28  ;;  %s3354_s28 = scalar_lea.vmem %s3790_s9, %s2740_s20 }
  0x1b   : > { %s2743_s27 = sshll.u32 %s3311_s30, 7  ;;  %s646_s3 = scalar_lea.vmem %s3793_s12, %s3311_s30 }
  0x1c   : > { %s3365_s2 = scalar_lea.vmem %s3792_s11, %s2743_s27  ;;  %652 = sbr.rel (%p2663_p5) target bundleno = 36 (0x24), region = 76 }
  0x21   : > { %v653_v0 = vld [vmem:[%s3781_s0] sm:$0xff]  ;;  %vm657_vm0 = vcmask 523264   ;;  %v654_v1 = vld [vmem:[%s3781_s0 + $0x8] sm:$0xff]  ;;  %v655_v2 = vld [vmem:[%s3781_s0 + $0x10] sm:$0xff] }
  0x22   : > { %658 = vst.msk [vmem:[#allocation2] sm:$0xff] %vm657_vm0, %v653_v0  ;;  %659 = vst.msk [vmem:[#allocation2 + $0x8] sm:$0xff] %vm657_vm0, %v654_v1  ;;  %v656_v3 = vld [vmem:[%s3781_s0 + $0x18] sm:$0xff] }
  0x23   : > { %660 = vst.msk [vmem:[#allocation2 + $0x10] sm:$0xff] %vm657_vm0, %v655_v2  ;;  %661 = vst.msk [vmem:[#allocation2 + $0x18] sm:$0xff] %vm657_vm0, %v656_v3 }
  0x24 PF: > { %vm668_vm1 = vcmask 523264   ;;  %v2992_v32 = vld [vmem:[%s3326_s24 + $0x34] ss:$8 sps:$4 sm:$0xff]   ;;  %v2994_v33 = vld [vmem:[%s3326_s24 + $0x30] ss:$8 sps:$4 sm:$0xff]   ;;  %v3204_v36 = vmov 0   ;;  %s3808_s27 = scalar_lea.vmem %s3782_s1, %s3311_s30  ;;  %s3813_s17 = scalar_lea.vmem %s3788_s7, %s3311_s30 }
  0x25   : > { %v2995_v34 = vld [vmem:[%s3326_s24 + $0x24] ss:$8 sps:$4 sm:$0xff]   ;;  %818 = vmatprep.subr.bf16.mxu0 %v2992_v32  ;;  %v2997_v35 = vld [vmem:[%s3326_s24 + $0x20] ss:$8 sps:$4 sm:$0xff]   ;;  %842 = vmatprep.mubr.bf16.mxu0 %v3204_v36  ;;  %v2998_v37 = vld [vmem:[%s3326_s24 + $0x14] ss:$8 sps:$4 sm:$0xff]  }
  0x26   : > { %819 = vmatpush1.bf16.msra.mxu0 %v2994_v33  ;;  %v3000_v38 = vld [vmem:[%s3326_s24 + $0x10] ss:$8 sps:$4 sm:$0xff]   ;;  %v3001_v39 = vld [vmem:[%s3326_s24 + $0x4] ss:$8 sps:$4 sm:$0xff]   ;;  %v3003_v40 = vld [vmem:[%s3326_s24] ss:$8 sps:$4 sm:$0xff]  }
  0x27   : > { %820 = vmatprep.subr.bf16.mxu0 %v2995_v34  ;;  %v2664_v55 = vld [vmem:[%s3808_s27] ss:$0 sm:$0xff]  ;;  %s3809_s19 = sld [smem:[#allocation9_spill]]  ;;  %vm3206_vm2 = vmmov 0   ;;  %s3207_s21 = smov 64   ;;  %vm877_vm3 = vcmask 130048  }
  0x28   : > { %s3811_s20 = sld [smem:[#allocation8_spill]]  ;;  %s3209_s23 = smov 48   ;;  %vm1891_vm6 = vcmask 261120   ;;  %vm1896_vm7 = vcmask 392192  }
  0x29   : > { %v662_v4 = vld [vmem:[#allocation2] sm:$0xff]  ;;  %v663_v6 = vld [vmem:[#allocation2 + $0x8] sm:$0xff]  ;;  %s3210_s15 = smov 112   ;;  %s3211_s13 = smov 32  }
  0x2a   : > { %v664_v5 = vld [vmem:[#allocation2 + $0x10] sm:$0xff]  ;;  %v669_v7 = vsel %vm668_vm1, %v662_v4, 0.0  ;;  %v665_v9 = vld [vmem:[#allocation2 + $0x18] sm:$0xff]  ;;  %v672_v10 = vsel %vm668_vm1, %v663_v6, 0.0  ;;  %821 = vmatpush1.bf16.msra.mxu0 %v2997_v35  ;;  %s3212_s22 = smov 96   ;;  %s3213_s26 = smov 16  }
  0x2b   : > { %v675_v8 = vsel %vm668_vm1, %v664_v5, 0.0  ;;  %670 = vadd.xlane.f32.xlu0 %v669_v7  ;;  %v678_v11 = vsel %vm668_vm1, %v665_v9, 0.0  ;;  %822 = vmatprep.subr.bf16.mxu0 %v2998_v37  ;;  %s3214_s25 = smov 80   ;;  %s3812_s27 = scalar_lea.vmem %s3787_s6, %s3311_s30 }
  0x2c   : > { %676 = vadd.xlane.f32.xlu1 %v675_v8 }
  0x2d   : > { %s3810_s4 = scalar_lea.vmem %s3809_s19, %s3311_s30  ;;  %s3215_s30 = smov [#allocation2]  }
  0x2e   : > { %823 = vmatpush1.bf16.msra.mxu0 %v3000_v38  ;;  %v2665_v60 = vld [vmem:[%s3810_s4] ss:$0 sm:$0xff] }
  0x2f   : > { %673 = vadd.xlane.f32.xlu0 %v672_v10  ;;  %824 = vmatprep.subr.bf16.mxu0 %v3001_v39 }
  0x30   : > { %679 = vadd.xlane.f32.xlu1 %v678_v11 }
  0x32   : > { %825 = vmatpush1.bf16.msra.mxu0 %v3003_v40 }
  0xb4   : > { %v671_v12 = vpop.xlane.xlu0 %670 }
  0xb5   : > { %v677_v13 = vpop.xlane.xlu1 %676  ;;  %v682_v14 = vmul.f32 0.015625, %v671_v12  ;;  %v3205_v12 = vmov 0.0  }
  0xb6   : > { %v684_v15 = vmul.f32 0.015625, %v677_v13  ;;  %2810 = vmatprep.subr.bf16.mxu0 %v3205_v12  ;;  %2816 = vmatprep.subr.bf16.mxu1 %v3205_v12  ;;  %v752_v13 = vld [vmem:[%s3811_s20] sm:$0x3] }
  0xb7   : > { %v686_v16 = vsub.f32 %v662_v4, %v682_v14  ;;  %2818 = vmatprep.mubr.msk.bf16.mxu1 %vm3206_vm2, %v3205_v12 }
  0xb8   : > { %v3388_v17 = vsub.f32 %v664_v5, %v684_v15  ;;  %v674_v18 = vpop.xlane.xlu0 %673 }
  0xb9   : > { %v680_v19 = vpop.xlane.xlu1 %679  ;;  %v683_v20 = vmul.f32 0.015625, %v674_v18  ;;  %v690_v22 = vmul.f32 %v686_v16, %v686_v16 }
  0xba   : > { %v685_v21 = vmul.f32 0.015625, %v680_v19  ;;  %v692_v23 = vmul.f32 %v3388_v17, %v3388_v17 }
  0xbb   : > { %v687_v24 = vsub.f32 %v663_v6, %v683_v20  ;;  %v694_v26 = vsel %vm668_vm1, %v690_v22, 0.0 }
  0xbc   : > { %v689_v25 = vsub.f32 %v665_v9, %v685_v21  ;;  %695 = vadd.xlane.f32.xlu0 %v694_v26  ;;  %v700_v27 = vsel %vm668_vm1, %v692_v23, 0.0  ;;  %v754_v9 = vlaneseq }
  0xbd   : > { %v691_v28 = vmul.f32 %v687_v24, %v687_v24 }
  0xbe   : > { %v693_v29 = vmul.f32 %v689_v25, %v689_v25  ;;  %v3419_v10 = vshrl.u32 %v754_v9, 7 }
  0xbf   : > { %v697_v30 = vsel %vm668_vm1, %v691_v28, 0.0 }
  0xc0   : > { %701 = vadd.xlane.f32.xlu0 %v700_v27  ;;  %698 = vadd.xlane.f32.xlu1 %v697_v30  ;;  %v703_v31 = vsel %vm668_vm1, %v693_v29, 0.0  ;;  %v756_v11 = vsub.s32 0, %v3419_v10  ;;  %v760_v14 = vsub.s32 1, %v3419_v10 }
  0xc2   : > { %v761_v18 = vrot.slane %v752_v13, %v760_v14 }
  0xc4   : > { %704 = vadd.xlane.f32.xlu1 %v703_v31 }
 0x145   : > { %v696_v41 = vpop.xlane.xlu0 %695 }
 0x146   : > { %v706_v42 = vmul.f32 0.015625, %v696_v41 }
 0x148   : > { %v710_v43 = vadd.f32 1e-05, %v706_v42  ;;  %v867_v42 = vand.u32 127, %v754_v9 }
 0x149   : > { %v699_v44 = vpop.xlane.xlu1 %698  ;;  %v702_v45 = vpop.xlane.xlu0 %701 }
 0x14a   : > { %3036 = vrsqrt.f32 %v710_v43  ;;  %v707_v46 = vmul.f32 0.015625, %v699_v44  ;;  %v708_v47 = vmul.f32 0.015625, %v702_v45  ;;  %vm868_vm4 = vcmp.le.s32.totalorder %v867_v42, %v3419_v10 }
 0x14b   : > { %v865_v43 = vadd.s32 8, %v3419_v10  ;;  %v3208_v44 = vmov -inf  }
 0x14c   : > { %v711_v48 = vadd.f32 1e-05, %v707_v46  ;;  %v712_v49 = vadd.f32 1e-05, %v708_v47  ;;  %v3462_v45 = vsel %vm868_vm4, 0.0, %v3208_v44 }
 0x14d   : > { %v705_v50 = vpop.xlane.xlu1 %704  ;;  %vm869_vm5 = vcmp.le.s32.totalorder %v867_v42, %v865_v43 }
 0x14e   : > { %3038 = vrsqrt.f32 %v711_v48  ;;  %v709_v51 = vmul.f32 0.015625, %v705_v50 }
 0x14f   : > { %3040 = vrsqrt.f32 %v712_v49  ;;  %v3465_v49 = vsel %vm869_vm5, 0.0, %v3208_v44 }
 0x150   : > { %v713_v52 = vadd.f32 1e-05, %v709_v51 }
 0x152   : > { %3042 = vrsqrt.f32 %v713_v52 }
 0x157   : > { %v3037_v53 = vpop.eup %3036 }
 0x158   : > { %v718_v54 = vmul.f32 %v3037_v53, %v686_v16  ;;  %v757_v16 = vrot.slane %v752_v13, %v756_v11 }
 0x15a   : > { %v728_v58 = vmul.f32 %v2664_v55, %v718_v54 }
 0x15b   : > { %v3039_v56 = vpop.eup %3038 }
 0x15c   : > { %v719_v57 = vmul.f32 %v3039_v56, %v687_v24  ;;  %v3041_v59 = vpop.eup %3040  ;;  %v738_v63 = vadd.f32 %v2665_v60, %v728_v58 }
 0x15d   : > { %v720_v1 = vmul.f32 %v3041_v59, %v3388_v17 }
 0x15e   : > { %v729_v61 = vmul.f32 %v2664_v55, %v719_v57 }
 0x15f   : > { %v3043_v62 = vpop.eup %3042  ;;  %v730_v5 = vmul.f32 %v2664_v55, %v720_v1 }
 0x160   : > { %v739_v0 = vadd.f32 %v2665_v60, %v729_v61  ;;  %v721_v2 = vmul.f32 %v3043_v62, %v689_v25 }
 0x161   : > { %v740_v7 = vadd.f32 %v2665_v60, %v730_v5 }
 0x162   : > { %v742_v3 = vpack.c.bf16 %v739_v0, %v738_v63  ;;  %v731_v4 = vmul.f32 %v2664_v55, %v721_v2 }
 0x164   : > { %2674 = vmatmul.mubr.msk.bf16.vlgmr.msra.gmra.mxu0 %vm668_vm1, %v742_v3  ;;  %v741_v6 = vadd.f32 %v2665_v60, %v731_v4 }
 0x165   : > { %852 = vmatprep.mubr.bf16.mxu0 %v3204_v36 }
 0x166   : > { %v743_v8 = vpack.c.bf16 %v741_v6, %v740_v7 }
 0x16c   : > { %2675 = vmatmul.mubr.msk.bf16.gmra.mxu0 %vm668_vm1, %v743_v8 }
 0x16d   : > { %2812 = vmatprep.mubr.msk.bf16.mxu0 %vm3206_vm2, %v3205_v12 }
 0x224   : > { %v844_v15 = vpop.f32.mrf.mxu0 }
 0x225   : > { %v845_v20 = vadd.f32 %v844_v15, %v757_v16 }
 0x226   : > { %v846_v17 = vpop.f32.mrf.mxu0 }
 0x227   : > { %v847_v23 = vadd.f32 %v846_v17, %v761_v18 }
 0x228   : > { %v848_v19 = vpop.f32.mrf.mxu0 }
 0x229   : > { %v849_v21 = vadd.f32 %v848_v19, %v757_v16 }
 0x22a   : > { %v850_v22 = vpop.f32.mrf.mxu0 }
 0x22b   : > { %v3434_v24 = vpack.c.bf16 %v849_v21, %v845_v20  ;;  %v851_v25 = vadd.f32 %v850_v22, %v761_v18 }
 0x22c   : > { %v854_v26 = vpop.f32.mrf.mxu0 }
 0x22d   : > { %v3436_v27 = vpack.c.bf16 %v851_v25, %v847_v23  ;;  %875 = vrot.lane.b32.xlu0 %v3434_v24, %s3207_s21  ;;  %v855_v30 = vadd.f32 %v854_v26, %v757_v16 }
 0x22e   : > { %v856_v28 = vpop.f32.mrf.mxu0 }
 0x22f   : > { %v857_v38 = vadd.f32 %v856_v28, %v761_v18 }
 0x230   : > { %v858_v29 = vpop.f32.mrf.mxu0 }
 0x231   : > { %v859_v31 = vadd.f32 %v858_v29, %v757_v16 }
 0x232   : > { %v860_v34 = vpop.f32.mrf.mxu0 }
 0x233   : > { %v3439_v32 = vpack.c.bf16 %v859_v31, %v855_v30  ;;  %v861_v37 = vadd.f32 %v860_v34, %v761_v18 }
 0x235   : > { %926 = vrot.lane.b32.xlu1 %v3439_v32, %s3207_s21  ;;  %v3444_v39 = vpack.c.bf16 %v861_v37, %v857_v38 }
 0x29f   : > { %v876_v33 = vpop.permute.xlu0 %875 }
 0x2a0   : > { %v882_v35 = vsel %vm877_vm3, %v876_v33, 0 }
 0x2a1   : > { %2811 = vmatpush3.bf16.xpose.msra.mxu0 %v882_v35 }
 0x2a2   : > { %2828 = vmatprep.subr.bf16.mxu0 %v3205_v12 }
 0x2a7   : > { %v927_v40 = vpop.permute.xlu1 %926 }
 0x2a8   : > { %2813 = vmatmul.mubr.msk.bf16.vlgmr.msra.gmra.mxu0 %vm877_vm3, %v3434_v24  ;;  %v932_v41 = vsel %vm877_vm3, %v927_v40, 0 }
 0x2a9   : > { %2817 = vmatpush3.bf16.xpose.msra.mxu1 %v932_v41  ;;  %2829 = vmatpush3.bf16.msra.mxu0 %v3444_v39 }
 0x2aa   : > { %2822 = vmatprep.subr.bf16.mxu1 %v3205_v12  ;;  %2830 = vmatprep.mubr.msk.bf16.mxu0 %vm3206_vm2, %v3205_v12 }
 0x2ab   : > { %2840 = vmatprep.subr.bf16.mxu0 %v3205_v12 }
 0x2b0   : > { %2819 = vmatmul.mubr.msk.bf16.vlgmr.msra.gmra.mxu1 %vm877_vm3, %v3439_v32 }
 0x2b1   : > { %2823 = vmatpush3.bf16.msra.mxu1 %v3436_v27  ;;  %2824 = vmatprep.mubr.msk.bf16.mxu1 %vm3206_vm2, %v3205_v12 }
 0x2b2   : > { %2834 = vmatprep.subr.bf16.mxu1 %v3205_v12 }
 0x368   : > { %v918_v46 = vpop.f32.mrf.mxu0 }
 0x369   : > { %v919_v47 = vadd.f32 %v918_v46, %v3462_v45 }
 0x36a   : > { %v2814_v48 = vpop.f32.mrf.mxu0 }
 0x36b   : > { %v975_v50 = vsel %vm877_vm3, %v919_v47, -inf }
 0x36c   : > { %976 = vmax.xlane.f32.xlu1 %v975_v50  ;;  %v921_v51 = vpop.f32.mrf.mxu0 }
 0x36d   : > { %v922_v52 = vadd.f32 %v921_v51, %v3465_v49 }
 0x36e   : > { %v2815_v53 = vpop.f32.mrf.mxu0 }
 0x36f   : > { %v978_v54 = vsel %vm877_vm3, %v922_v52, -inf }
 0x370   : > { %v968_v55 = vpop.f32.mrf.mxu1  ;;  %979 = vmax.xlane.f32.xlu0 %v978_v54 }
 0x371   : > { %v969_v56 = vadd.f32 %v968_v55, %v3462_v45 }
 0x372   : > { %v2820_v57 = vpop.f32.mrf.mxu1 }
 0x373   : > { %v981_v58 = vsel %vm877_vm3, %v969_v56, -inf }
 0x374   : > { %v971_v59 = vpop.f32.mrf.mxu1  ;;  %982 = vmax.xlane.f32.xlu0 %v981_v58 }
 0x375   : > { %v972_v60 = vadd.f32 %v971_v59, %v3465_v49 }
 0x376   : > { %v2821_v61 = vpop.f32.mrf.mxu1 }
 0x377   : > { %v984_v62 = vsel %vm877_vm3, %v972_v60, -inf }
 0x378   : > { %985 = vmax.xlane.f32.xlu1 %v984_v62 }
 0x3f5   : > { %v977_v63 = vpop.xlane.xlu1 %976 }
 0x3f6   : > { %v987_v0 = vsub.f32 %v919_v47, %v977_v63 }
 0x3f8   : > { %v991_v1 = vmul.f32 1.442695, %v987_v0 }
 0x3f9   : > { %v980_v2 = vpop.xlane.xlu0 %979 }
 0x3fa   : > { %3044 = vpow2.f32 %v991_v1  ;;  %v988_v3 = vsub.f32 %v922_v52, %v980_v2 }
 0x3fc   : > { %v993_v4 = vmul.f32 1.442695, %v988_v3 }
 0x3fd   : > { %v983_v5 = vpop.xlane.xlu0 %982 }
 0x3fe   : > { %3046 = vpow2.f32 %v993_v4  ;;  %v989_v6 = vsub.f32 %v969_v56, %v983_v5 }
 0x400   : > { %v995_v7 = vmul.f32 1.442695, %v989_v6 }
 0x401   : > { %v986_v18 = vpop.xlane.xlu1 %985 }
 0x402   : > { %3048 = vpow2.f32 %v995_v7  ;;  %v990_v19 = vsub.f32 %v972_v60, %v986_v18 }
 0x404   : > { %v997_v20 = vmul.f32 1.442695, %v990_v19 }
 0x406   : > { %3050 = vpow2.f32 %v997_v20 }
 0x407   : > { %v3045_v8 = vpop.eup %3044 }
 0x408   : > { %v999_v9 = vsel %vm877_vm3, %v3045_v8, 0.0 }
 0x409   : > { %1000 = vadd.xlane.f32.xlu0 %v999_v9 }
 0x40b   : > { %v3047_v13 = vpop.eup %3046 }
 0x40c   : > { %v1002_v15 = vsel %vm877_vm3, %v3047_v13, 0.0 }
 0x40d   : > { %1003 = vadd.xlane.f32.xlu1 %v1002_v15 }
 0x40f   : > { %v3049_v16 = vpop.eup %3048 }
 0x410   : > { %v1005_v17 = vsel %vm877_vm3, %v3049_v16, 0.0 }
 0x411   : > { %1006 = vadd.xlane.f32.xlu0 %v1005_v17 }
 0x413   : > { %v3051_v21 = vpop.eup %3050 }
 0x414   : > { %v1008_v22 = vsel %vm877_vm3, %v3051_v21, 0.0 }
 0x41e   : > { %1164 = vrot.lane.b32.xlu1 %v3439_v32, %s3209_s23 }
 0x427   : > { %1113 = vrot.lane.b32.xlu0 %v3434_v24, %s3209_s23 }
 0x442   : > { %1009 = vadd.xlane.f32.xlu1 %v1008_v22 }
 0x453   : > { %1111 = vrot.lane.b32.xlu1 %v3434_v24, %s3210_s15 }
 0x457   : > { %1162 = vrot.lane.b32.xlu1 %v3439_v32, %s3210_s15 }
 0x492   : > { %v1001_v23 = vpop.xlane.xlu0 %1000 }
 0x493   : > { %3052 = vrcp.f32 %v1001_v23 }
 0x496   : > { %v1004_v25 = vpop.xlane.xlu1 %1003 }
 0x497   : > { %3054 = vrcp.f32 %v1004_v25 }
 0x49a   : > { %v1007_v26 = vpop.xlane.xlu0 %1006  ;;  %v1165_v37 = vpop.permute.xlu1 %1164 }
 0x49b   : > { %3056 = vrcp.f32 %v1007_v26  ;;  %v1170_v47 = vsel %vm877_vm3, %v1165_v37, 0 }
 0x49e   : > { %v1114_v33 = vpop.permute.xlu0 %1113 }
 0x49f   : > { %v1119_v35 = vsel %vm877_vm3, %v1114_v33, 0 }
 0x4a0   : > { %v3053_v28 = vpop.eup %3052 }
 0x4a1   : > { %v1015_v30 = vmul.f32 %v3053_v28, %v3045_v8 }
 0x4a4   : > { %v3055_v29 = vpop.eup %3054 }
 0x4a5   : > { %v1016_v31 = vmul.f32 %v3055_v29, %v3047_v13 }
 0x4a7   : > { %v1019_v34 = vpack.c.bf16 %v1016_v31, %v1015_v30 }
 0x4a8   : > { %v3057_v41 = vpop.eup %3056 }
 0x4a9   : > { %2825 = vmatmul.mubr.msk.bf16.vlgmr.msra.gmra.mxu1 %vm877_vm3, %v1019_v34  ;;  %v1017_v43 = vmul.f32 %v3057_v41, %v3049_v16 }
 0x4aa   : > { %2835 = vmatpush3.bf16.xpose.msra.mxu1 %v1119_v35  ;;  %2836 = vmatprep.mubr.msk.bf16.mxu1 %vm3206_vm2, %v3205_v12 }
 0x4ab   : > { %2846 = vmatprep.subr.bf16.mxu1 %v3205_v12 }
 0x4cb   : > { %v1010_v38 = vpop.xlane.xlu1 %1009 }
 0x4cc   : > { %3058 = vrcp.f32 %v1010_v38 }
 0x4cf   : > { %v1112_v40 = vpop.permute.xlu1 %1111 }
 0x4d0   : > { %2837 = vmatmul.mubr.msk.bf16.vlgmr.msra.gmra.mxu1 %vm877_vm3, %v1112_v40 }
 0x4d1   : > { %2848 = vmatprep.mubr.msk.bf16.mxu1 %vm3206_vm2, %v3205_v12 }
 0x4d3   : > { %v1163_v48 = vpop.permute.xlu1 %1162 }
 0x4d9   : > { %v3059_v42 = vpop.eup %3058 }
 0x4da   : > { %v1018_v44 = vmul.f32 %v3059_v42, %v3051_v21 }
 0x4dc   : > { %v1020_v46 = vpack.c.bf16 %v1018_v44, %v1017_v43 }
 0x4de   : > { %2831 = vmatmul.mubr.msk.bf16.vlgmr.msra.gmra.mxu0 %vm877_vm3, %v1020_v46 }
 0x4df   : > { %2841 = vmatpush3.bf16.xpose.msra.mxu0 %v1170_v47  ;;  %2842 = vmatprep.mubr.msk.bf16.mxu0 %vm3206_vm2, %v3205_v12 }
 0x4e0   : > { %2852 = vmatprep.subr.bf16.mxu0 %v3205_v12 }
 0x4e6   : > { %2843 = vmatmul.mubr.msk.bf16.vlgmr.msra.gmra.mxu0 %vm877_vm3, %v1163_v48 }
 0x4e7   : > { %2854 = vmatprep.mubr.msk.bf16.mxu0 %vm3206_vm2, %v3205_v12 }
 0x569   : > { %v3502_v50 = vpop.f32.mrf.mxu1 }
 0x56b   : > { %v2826_v51 = vpop.f32.mrf.mxu1 }
 0x56d   : > { %v3504_v52 = vpop.f32.mrf.mxu1 }
 0x56f   : > { %v2827_v53 = vpop.f32.mrf.mxu1 }
 0x590   : > { %v1155_v54 = vpop.f32.mrf.mxu1 }
 0x591   : > { %v1156_v55 = vadd.f32 %v1155_v54, %v3462_v45 }
 0x592   : > { %v2838_v56 = vpop.f32.mrf.mxu1 }
 0x593   : > { %v1213_v57 = vsel %vm877_vm3, %v1156_v55, -inf }
 0x594   : > { %1214 = vmax.xlane.f32.xlu0 %v1213_v57  ;;  %v1158_v58 = vpop.f32.mrf.mxu1 }
 0x595   : > { %v1159_v59 = vadd.f32 %v1158_v58, %v3465_v49 }
 0x596   : > { %v2839_v60 = vpop.f32.mrf.mxu1 }
 0x597   : > { %v1216_v61 = vsel %vm877_vm3, %v1159_v59, -inf }
 0x598   : > { %1217 = vmax.xlane.f32.xlu1 %v1216_v61 }
 0x59e   : > { %v3510_v62 = vpop.f32.mrf.mxu0 }
 0x5a0   : > { %v2832_v63 = vpop.f32.mrf.mxu0 }
 0x5a2   : > { %v3512_v0 = vpop.f32.mrf.mxu0 }
 0x5a4   : > { %v2833_v1 = vpop.f32.mrf.mxu0 }
 0x5a6   : > { %v1206_v2 = vpop.f32.mrf.mxu0 }
 0x5a7   : > { %v1207_v3 = vadd.f32 %v1206_v2, %v3462_v45 }
 0x5a8   : > { %v2844_v4 = vpop.f32.mrf.mxu0 }
 0x5a9   : > { %v1219_v5 = vsel %vm877_vm3, %v1207_v3, -inf }
 0x5aa   : > { %1220 = vmax.xlane.f32.xlu0 %v1219_v5  ;;  %v1209_v6 = vpop.f32.mrf.mxu0 }
 0x5ab   : > { %v1210_v7 = vadd.f32 %v1209_v6, %v3465_v49 }
 0x5ac   : > { %v2845_v8 = vpop.f32.mrf.mxu0 }
 0x5ad   : > { %v1222_v9 = vsel %vm877_vm3, %v1210_v7, -inf }
 0x5ae   : > { %1223 = vmax.xlane.f32.xlu0 %v1222_v9 }
 0x61d   : > { %v1215_v13 = vpop.xlane.xlu0 %1214 }
 0x61e   : > { %v1225_v15 = vsub.f32 %v1156_v55, %v1215_v13 }
 0x620   : > { %v1229_v16 = vmul.f32 1.442695, %v1225_v15 }
 0x621   : > { %v1218_v17 = vpop.xlane.xlu1 %1217 }
 0x622   : > { %3060 = vpow2.f32 %v1229_v16  ;;  %v1226_v18 = vsub.f32 %v1159_v59, %v1218_v17 }
 0x624   : > { %v1231_v19 = vmul.f32 1.442695, %v1226_v18 }
 0x626   : > { %3062 = vpow2.f32 %v1231_v19 }
 0x62f   : > { %v3061_v20 = vpop.eup %3060 }
 0x630   : > { %v1237_v21 = vsel %vm877_vm3, %v3061_v20, 0.0 }
 0x631   : > { %1238 = vadd.xlane.f32.xlu0 %v1237_v21 }
 0x633   : > { %v3063_v22 = vpop.eup %3062  ;;  %v1221_v23 = vpop.xlane.xlu0 %1220 }
 0x634   : > { %v1227_v25 = vsub.f32 %v1207_v3, %v1221_v23  ;;  %v1240_v26 = vsel %vm877_vm3, %v3063_v22, 0.0 }
 0x635   : > { %1241 = vadd.xlane.f32.xlu1 %v1240_v26 }
 0x636   : > { %v1233_v28 = vmul.f32 1.442695, %v1227_v25 }
 0x637   : > { %v1224_v31 = vpop.xlane.xlu0 %1223 }
 0x638   : > { %3064 = vpow2.f32 %v1233_v28  ;;  %v1228_v33 = vsub.f32 %v1210_v7, %v1224_v31 }
 0x63a   : > { %v1235_v34 = vmul.f32 1.442695, %v1228_v33 }
 0x63c   : > { %3066 = vpow2.f32 %v1235_v34 }
 0x645   : > { %v3065_v29 = vpop.eup %3064 }
 0x646   : > { %1308 = vrot.lane.b32.xlu1 %v3444_v39, %s3210_s15  ;;  %v1243_v30 = vsel %vm877_vm3, %v3065_v29, 0.0 }
 0x647   : > { %1244 = vadd.xlane.f32.xlu0 %v1243_v30 }
 0x649   : > { %v3067_v35 = vpop.eup %3066 }
 0x64a   : > { %1357 = vrot.lane.b32.xlu1 %v3434_v24, %s3211_s13  ;;  %v1246_v37 = vsel %vm877_vm3, %v3067_v35, 0.0 }
 0x65d   : > { %1260 = vrot.lane.b32.xlu0 %v3436_v27, %s3210_s15 }
 0x661   : > { %1355 = vrot.lane.b32.xlu0 %v3434_v24, %s3212_s22 }
 0x66e   : > { %1247 = vadd.xlane.f32.xlu1 %v1246_v37 }
 0x67f   : > { %1408 = vrot.lane.b32.xlu1 %v3439_v32, %s3211_s13 }
 0x683   : > { %1406 = vrot.lane.b32.xlu1 %v3439_v32, %s3212_s22 }
 0x6ba   : > { %v1239_v40 = vpop.xlane.xlu0 %1238 }
 0x6be   : > { %v1242_v38 = vpop.xlane.xlu1 %1241 }
 0x6bf   : > { %3068 = vrcp.f32 %v1242_v38 }
 0x6c0   : > { %3070 = vrcp.f32 %v1239_v40 }
 0x6c2   : > { %v1309_v41 = vpop.permute.xlu1 %1308 }
 0x6c3   : > { %2853 = vmatpush3.bf16.msra.mxu0 %v1309_v41 }
 0x6c4   : > { %2864 = vmatprep.subr.bf16.mxu0 %v3205_v12 }
 0x6c6   : > { %v1358_v51 = vpop.permute.xlu1 %1357 }
 0x6c7   : > { %v1363_v54 = vsel %vm877_vm3, %v1358_v51, 0 }
 0x6cc   : > { %v3069_v42 = vpop.eup %3068 }
 0x6cd   : > { %v3071_v44 = vpop.eup %3070  ;;  %v1254_v46 = vmul.f32 %v3069_v42, %v3063_v22 }
 0x6ce   : > { %v1253_v48 = vmul.f32 %v3071_v44, %v3061_v20 }
 0x6d0   : > { %v1245_v43 = vpop.xlane.xlu0 %1244  ;;  %v1257_v53 = vpack.c.bf16 %v1254_v46, %v1253_v48 }
 0x6d1   : > { %3072 = vrcp.f32 %v1245_v43 }
 0x6d4   : > { %v1261_v47 = vpop.permute.xlu0 %1260 }
 0x6d5   : > { %2847 = vmatpush3.bf16.msra.mxu1 %v1261_v47 }
 0x6d6   : > { %2858 = vmatprep.subr.bf16.mxu1 %v3205_v12 }
 0x6d8   : > { %2849 = vmatmul.mubr.msk.bf16.vlgmr.msra.gmra.mxu1 %vm877_vm3, %v1257_v53  ;;  %v1356_v55 = vpop.permute.xlu0 %1355 }
 0x6d9   : > { %2859 = vmatpush3.bf16.xpose.msra.mxu1 %v1363_v54  ;;  %2860 = vmatprep.mubr.msk.bf16.mxu1 %vm3206_vm2, %v3205_v12 }
 0x6da   : > { %2870 = vmatprep.subr.bf16.mxu1 %v3205_v12 }
 0x6de   : > { %v3073_v57 = vpop.eup %3072 }
 0x6df   : > { %v1255_v59 = vmul.f32 %v3073_v57, %v3065_v29 }
 0x6e0   : > { %2861 = vmatmul.mubr.msk.bf16.vlgmr.msra.gmra.mxu1 %vm877_vm3, %v1356_v55 }
 0x6e1   : > { %2872 = vmatprep.mubr.msk.bf16.mxu1 %vm3206_vm2, %v3205_v12 }
 0x6f7   : > { %v1248_v56 = vpop.xlane.xlu1 %1247 }
 0x6f8   : > { %3074 = vrcp.f32 %v1248_v56 }
 0x6fb   : > { %v1409_v61 = vpop.permute.xlu1 %1408 }
 0x6fc   : > { %v1414_v1 = vsel %vm877_vm3, %v1409_v61, 0 }
 0x6ff   : > { %v1407_v2 = vpop.permute.xlu1 %1406 }
 0x705   : > { %v3075_v58 = vpop.eup %3074 }
 0x706   : > { %v1256_v60 = vmul.f32 %v3075_v58, %v3067_v35 }
 0x708   : > { %v1258_v63 = vpack.c.bf16 %v1256_v60, %v1255_v59 }
 0x70a   : > { %2855 = vmatmul.mubr.msk.bf16.vlgmr.msra.gmra.mxu0 %vm877_vm3, %v1258_v63 }
 0x70b   : > { %2865 = vmatpush3.bf16.xpose.msra.mxu0 %v1414_v1  ;;  %2866 = vmatprep.mubr.msk.bf16.mxu0 %vm3206_vm2, %v3205_v12 }
 0x70c   : > { %2876 = vmatprep.subr.bf16.mxu0 %v3205_v12 }
 0x712   : > { %2867 = vmatmul.mubr.msk.bf16.vlgmr.msra.gmra.mxu0 %vm877_vm3, %v1407_v2 }
 0x713   : > { %2878 = vmatprep.mubr.msk.bf16.mxu0 %vm3206_vm2, %v3205_v12 }
 0x798   : > { %v3552_v3 = vpop.f32.mrf.mxu1 }
 0x79a   : > { %v2850_v4 = vpop.f32.mrf.mxu1 }
 0x79c   : > { %v3554_v5 = vpop.f32.mrf.mxu1 }
 0x79d   : > { %v2962_v6 = vpack.i.bf16 %v3554_v5, %v3552_v3 }
 0x79e   : > { %v2851_v7 = vpop.f32.mrf.mxu1 }
 0x7a0   : > { %v1399_v8 = vpop.f32.mrf.mxu1 }
 0x7a1   : > { %v1400_v9 = vadd.f32 %v1399_v8, %v3462_v45 }
 0x7a2   : > { %v2862_v13 = vpop.f32.mrf.mxu1 }
 0x7a3   : > { %v1457_v15 = vsel %vm877_vm3, %v1400_v9, -inf }
 0x7a4   : > { %1458 = vmax.xlane.f32.xlu0 %v1457_v15  ;;  %v1402_v16 = vpop.f32.mrf.mxu1 }
 0x7a5   : > { %v1403_v17 = vadd.f32 %v1402_v16, %v3465_v49 }
 0x7a6   : > { %v2863_v18 = vpop.f32.mrf.mxu1 }
 0x7a7   : > { %v1460_v19 = vsel %vm877_vm3, %v1403_v17, -inf }
 0x7a8   : > { %1461 = vmax.xlane.f32.xlu1 %v1460_v19 }
 0x7ca   : > { %v3562_v20 = vpop.f32.mrf.mxu0 }
 0x7cc   : > { %v2856_v21 = vpop.f32.mrf.mxu0 }
 0x7ce   : > { %v3564_v22 = vpop.f32.mrf.mxu0 }
 0x7cf   : > { %v2967_v23 = vpack.i.bf16 %v3564_v22, %v3562_v20 }
 0x7d0   : > { %v2857_v25 = vpop.f32.mrf.mxu0 }
 0x7d2   : > { %v1450_v26 = vpop.f32.mrf.mxu0 }
 0x7d3   : > { %v1451_v28 = vadd.f32 %v1450_v26, %v3462_v45 }
 0x7d4   : > { %v2868_v29 = vpop.f32.mrf.mxu0 }
 0x7d5   : > { %v1463_v30 = vsel %vm877_vm3, %v1451_v28, -inf }
 0x7d6   : > { %1464 = vmax.xlane.f32.xlu0 %v1463_v30  ;;  %v1453_v31 = vpop.f32.mrf.mxu0 }
 0x7d7   : > { %v1454_v33 = vadd.f32 %v1453_v31, %v3465_v49 }
 0x7d8   : > { %v2869_v34 = vpop.f32.mrf.mxu0 }
 0x7d9   : > { %v1466_v35 = vsel %vm877_vm3, %v1454_v33, -inf }
 0x7da   : > { %1467 = vmax.xlane.f32.xlu0 %v1466_v35 }
 0x82d   : > { %v1459_v37 = vpop.xlane.xlu0 %1458 }
 0x82e   : > { %v1469_v38 = vsub.f32 %v1400_v9, %v1459_v37 }
 0x830   : > { %v1473_v40 = vmul.f32 1.442695, %v1469_v38 }
 0x831   : > { %v1462_v41 = vpop.xlane.xlu1 %1461 }
 0x832   : > { %3076 = vpow2.f32 %v1473_v40  ;;  %v1470_v42 = vsub.f32 %v1403_v17, %v1462_v41 }
 0x834   : > { %v1475_v43 = vmul.f32 1.442695, %v1470_v42 }
 0x836   : > { %3078 = vpow2.f32 %v1475_v43 }
 0x83f   : > { %v3077_v44 = vpop.eup %3076 }
 0x840   : > { %v1481_v46 = vsel %vm877_vm3, %v3077_v44, 0.0 }
 0x841   : > { %1482 = vadd.xlane.f32.xlu0 %v1481_v46 }
 0x843   : > { %v3079_v47 = vpop.eup %3078 }
 0x844   : > { %v1484_v48 = vsel %vm877_vm3, %v3079_v47, 0.0 }
 0x845   : > { %1485 = vadd.xlane.f32.xlu1 %v1484_v48 }
 0x856   : > { %1550 = vrot.lane.b32.xlu1 %v3444_v39, %s3212_s22 }
 0x85a   : > { %1599 = vrot.lane.b32.xlu1 %v3434_v24, %s3213_s26 }
 0x85f   : > { %v1465_v51 = vpop.xlane.xlu0 %1464 }
 0x860   : > { %v1471_v53 = vsub.f32 %v1451_v28, %v1465_v51 }
 0x862   : > { %v1477_v54 = vmul.f32 1.442695, %v1471_v53 }
 0x863   : > { %v1468_v55 = vpop.xlane.xlu0 %1467 }
 0x864   : > { %3080 = vpow2.f32 %v1477_v54  ;;  %v1472_v56 = vsub.f32 %v1454_v33, %v1468_v55 }
 0x866   : > { %v1479_v57 = vmul.f32 1.442695, %v1472_v56 }
 0x868   : > { %3082 = vpow2.f32 %v1479_v57 }
 0x871   : > { %v3081_v58 = vpop.eup %3080 }
 0x872   : > { %v1487_v59 = vsel %vm877_vm3, %v3081_v58, 0.0 }
 0x873   : > { %1488 = vadd.xlane.f32.xlu0 %v1487_v59 }
 0x875   : > { %v3083_v60 = vpop.eup %3082 }
 0x876   : > { %v1490_v61 = vsel %vm877_vm3, %v3083_v60, 0.0 }
 0x87e   : > { %1491 = vadd.xlane.f32.xlu1 %v1490_v61 }
 0x889   : > { %1503 = vrot.lane.b32.xlu0 %v3436_v27, %s3212_s22 }
 0x88d   : > { %1597 = vrot.lane.b32.xlu0 %v3434_v24, %s3214_s25 }
 0x88f   : > { %1650 = vrot.lane.b32.xlu1 %v3439_v32, %s3213_s26 }
 0x893   : > { %1648 = vrot.lane.b32.xlu1 %v3439_v32, %s3214_s25 }
 0x8ca   : > { %v1483_v2 = vpop.xlane.xlu0 %1482 }
 0x8ce   : > { %v1486_v63 = vpop.xlane.xlu1 %1485 }
 0x8cf   : > { %3084 = vrcp.f32 %v1486_v63 }
 0x8d0   : > { %3086 = vrcp.f32 %v1483_v2 }
 0x8d2   : > { %v1551_v1 = vpop.permute.xlu1 %1550 }
 0x8d3   : > { %2877 = vmatpush3.bf16.msra.mxu0 %v1551_v1 }
 0x8d4   : > { %2888 = vmatprep.subr.bf16.mxu0 %v3205_v12 }
 0x8d6   : > { %v1600_v15 = vpop.permute.xlu1 %1599 }
 0x8d7   : > { %v1605_v32 = vsel %vm877_vm3, %v1600_v15, 0 }
 0x8dc   : > { %v3085_v4 = vpop.eup %3084 }
 0x8dd   : > { %v3087_v8 = vpop.eup %3086  ;;  %v1498_v9 = vmul.f32 %v3085_v4, %v3079_v47 }
 0x8de   : > { %v1497_v24 = vmul.f32 %v3087_v8, %v3077_v44 }
 0x8e0   : > { %v1501_v16 = vpack.c.bf16 %v1498_v9, %v1497_v24 }
 0x8fc   : > { %v1489_v7 = vpop.xlane.xlu0 %1488 }
 0x8fd   : > { %3088 = vrcp.f32 %v1489_v7 }
 0x900   : > { %v1504_v13 = vpop.permute.xlu0 %1503 }
 0x901   : > { %2871 = vmatpush3.bf16.msra.mxu1 %v1504_v13 }
 0x902   : > { %2882 = vmatprep.subr.bf16.mxu1 %v3205_v12 }
 0x904   : > { %2873 = vmatmul.mubr.msk.bf16.vlgmr.msra.gmra.mxu1 %vm877_vm3, %v1501_v16  ;;  %v1598_v18 = vpop.permute.xlu0 %1597 }
 0x905   : > { %2883 = vmatpush3.bf16.xpose.msra.mxu1 %v1605_v32  ;;  %2884 = vmatprep.mubr.msk.bf16.mxu1 %vm3206_vm2, %v3205_v12 }
 0x906   : > { %2894 = vmatprep.subr.bf16.mxu1 %v3205_v12 }
 0x907   : > { %v1492_v17 = vpop.xlane.xlu1 %1491 }
 0x908   : > { %3090 = vrcp.f32 %v1492_v17 }
 0x90a   : > { %v3089_v19 = vpop.eup %3088 }
 0x90b   : > { %v1499_v25 = vmul.f32 %v3089_v19, %v3081_v58  ;;  %v1651_v28 = vpop.permute.xlu1 %1650 }
 0x90c   : > { %2885 = vmatmul.mubr.msk.bf16.vlgmr.msra.gmra.mxu1 %vm877_vm3, %v1598_v18  ;;  %v1656_v30 = vsel %vm877_vm3, %v1651_v28, 0 }
 0x90d   : > { %2896 = vmatprep.mubr.msk.bf16.mxu1 %vm3206_vm2, %v3205_v12 }
 0x90f   : > { %v1649_v31 = vpop.permute.xlu1 %1648 }
 0x915   : > { %v3091_v21 = vpop.eup %3090 }
 0x916   : > { %v1500_v26 = vmul.f32 %v3091_v21, %v3083_v60 }
 0x918   : > { %v1502_v29 = vpack.c.bf16 %v1500_v26, %v1499_v25 }
 0x91a   : > { %2879 = vmatmul.mubr.msk.bf16.vlgmr.msra.gmra.mxu0 %vm877_vm3, %v1502_v29 }
 0x91b   : > { %2889 = vmatpush3.bf16.xpose.msra.mxu0 %v1656_v30  ;;  %2890 = vmatprep.mubr.msk.bf16.mxu0 %vm3206_vm2, %v3205_v12 }
 0x91c   : > { %2900 = vmatprep.subr.bf16.mxu0 %v3205_v12 }
 0x922   : > { %2891 = vmatmul.mubr.msk.bf16.vlgmr.msra.gmra.mxu0 %vm877_vm3, %v1649_v31 }
 0x923   : > { %2902 = vmatprep.mubr.msk.bf16.mxu0 %vm3206_vm2, %v3205_v12 }
 0x9c4   : > { %v1543_v33 = vpop.f32.mrf.mxu1 }
 0x9c6   : > { %v2874_v34 = vpop.f32.mrf.mxu1 }
 0x9c8   : > { %v1546_v35 = vpop.f32.mrf.mxu1 }
 0x9c9   : > { %v2972_v37 = vpack.i.bf16 %v1546_v35, %v1543_v33 }
 0x9ca   : > { %v2875_v38 = vpop.f32.mrf.mxu1 }
 0x9cc   : > { %v1641_v40 = vpop.f32.mrf.mxu1 }
 0x9cd   : > { %v1642_v41 = vadd.f32 %v1641_v40, %v3462_v45 }
 0x9ce   : > { %v2886_v42 = vpop.f32.mrf.mxu1 }
 0x9cf   : > { %v1699_v43 = vsel %vm877_vm3, %v1642_v41, -inf  ;;  %v3005_v42 = vld [vmem:[%s3341_s18 + $0x10] sm:$0xff]  }
 0x9d0   : > { %1700 = vmax.xlane.f32.xlu0 %v1699_v43  ;;  %v1644_v44 = vpop.f32.mrf.mxu1 }
 0x9d1   : > { %v1645_v46 = vadd.f32 %v1644_v44, %v3465_v49  ;;  %v3006_v44 = vld [vmem:[%s3341_s18 + $0x8] sm:$0xff]  }
 0x9d2   : > { %v2887_v47 = vpop.f32.mrf.mxu1 }
 0x9d3   : > { %v1702_v48 = vsel %vm877_vm3, %v1645_v46, -inf }
 0x9d4   : > { %1703 = vmax.xlane.f32.xlu1 %v1702_v48 }
 0x9da   : > { %v1590_v12 = vpop.f32.mrf.mxu0 }
 0x9dc   : > { %v2880_v51 = vpop.f32.mrf.mxu0 }
 0x9dd   : > { %v3007_v51 = vld [vmem:[%s3341_s18] sm:$0xff]  }
 0x9de   : > { %v1593_v53 = vpop.f32.mrf.mxu0 }
 0x9df   : > { %v2977_v54 = vpack.i.bf16 %v1593_v53, %v1590_v12 }
 0x9e0   : > { %v2881_v55 = vpop.f32.mrf.mxu0 }
 0x9e2   : > { %v1692_v56 = vpop.f32.mrf.mxu0 }
 0x9e3   : > { %v1693_v57 = vadd.f32 %v1692_v56, %v3462_v45 }
 0x9e4   : > { %v2892_v58 = vpop.f32.mrf.mxu0 }
 0x9e5   : > { %v1705_v59 = vsel %vm877_vm3, %v1693_v57, -inf }
 0x9e6   : > { %1706 = vmax.xlane.f32.xlu0 %v1705_v59  ;;  %v1695_v60 = vpop.f32.mrf.mxu0 }
 0x9e7   : > { %v1696_v61 = vadd.f32 %v1695_v60, %v3465_v49 }
 0x9e8   : > { %v2893_v63 = vpop.f32.mrf.mxu0 }
 0x9e9   : > { %v1708_v1 = vsel %vm877_vm3, %v1696_v61, -inf }
 0x9ea   : > { %1709 = vmax.xlane.f32.xlu0 %v1708_v1 }
 0xa59   : > { %v1701_v2 = vpop.xlane.xlu0 %1700 }
 0xa5a   : > { %v1711_v4 = vsub.f32 %v1642_v41, %v1701_v2  ;;  %v3004_v41 = vld [vmem:[%s3341_s18 + $0x18] sm:$0xff]  }
 0xa5c   : > { %v1715_v7 = vmul.f32 1.442695, %v1711_v4 }
 0xa5d   : > { %v1704_v8 = vpop.xlane.xlu1 %1703 }
 0xa5e   : > { %3092 = vpow2.f32 %v1715_v7  ;;  %v1712_v9 = vsub.f32 %v1645_v46, %v1704_v8 }
 0xa60   : > { %v1717_v13 = vmul.f32 1.442695, %v1712_v9 }
 0xa62   : > { %3094 = vpow2.f32 %v1717_v13 }
 0xa6b   : > { %v3093_v45 = vpop.eup %3092 }
 0xa6c   : > { %v1723_v24 = vsel %vm877_vm3, %v3093_v45, 0.0 }
 0xa6d   : > { %1724 = vadd.xlane.f32.xlu0 %v1723_v24 }
 0xa6f   : > { %v3095_v15 = vpop.eup %3094  ;;  %v1707_v16 = vpop.xlane.xlu0 %1706 }
 0xa70   : > { %v1713_v32 = vsub.f32 %v1693_v57, %v1707_v16  ;;  %v1726_v49 = vsel %vm877_vm3, %v3095_v15, 0.0 }
 0xa71   : > { %1727 = vadd.xlane.f32.xlu1 %v1726_v49 }
 0xa72   : > { %v1719_v17 = vmul.f32 1.442695, %v1713_v32 }
 0xa73   : > { %v1710_v18 = vpop.xlane.xlu0 %1709 }
 0xa74   : > { %3096 = vpow2.f32 %v1719_v17  ;;  %v1714_v19 = vsub.f32 %v1696_v61, %v1710_v18 }
 0xa76   : > { %v1721_v21 = vmul.f32 1.442695, %v1714_v19 }
 0xa78   : > { %3098 = vpow2.f32 %v1721_v21 }
 0xa81   : > { %v3097_v25 = vpop.eup %3096 }
 0xa82   : > { %v1729_v26 = vsel %vm877_vm3, %v3097_v25, 0.0 }
 0xa83   : > { %1730 = vadd.xlane.f32.xlu0 %v1729_v26 }
 0xa85   : > { %v3099_v28 = vpop.eup %3098 }
 0xa86   : > { %v1732_v29 = vsel %vm877_vm3, %v3099_v28, 0.0 }
 0xa87   : > { %1733 = vadd.xlane.f32.xlu1 %v1732_v29 }
 0xa98   : > { %1792 = vrot.lane.b32.xlu1 %v3444_v39, %s3214_s25 }
 0xa99   : > { %1745 = vrot.lane.b32.xlu0 %v3436_v27, %s3214_s25 }
 0xa9c   : > { %2963 = vrot.lane.b32.xlu1 %v2962_v6, %s3213_s26 }
 0xa9d   : > { %2973 = vrot.lane.b32.xlu0 %v2972_v37, %s3211_s13 }
 0xaa0   : > { %2968 = vrot.lane.b32.xlu1 %v2967_v23, %s3213_s26 }
 0xaa4   : > { %2978 = vrot.lane.b32.xlu1 %v2977_v54, %s3211_s13 }
 0xaf6   : > { %v1725_v31 = vpop.xlane.xlu0 %1724 }
 0xafa   : > { %v1728_v30 = vpop.xlane.xlu1 %1727 }
 0xafb   : > { %3100 = vrcp.f32 %v1728_v30 }
 0xafc   : > { %3102 = vrcp.f32 %v1725_v31 }
 0xb08   : > { %v3101_v39 = vpop.eup %3100 }
 0xb09   : > { %v3103_v33 = vpop.eup %3102  ;;  %v1740_v34 = vmul.f32 %v3101_v39, %v3095_v15 }
 0xb0a   : > { %v1739_v6 = vmul.f32 %v3103_v33, %v3093_v45 }
 0xb0c   : > { %v1731_v27 = vpop.xlane.xlu0 %1730  ;;  %v1743_v20 = vpack.c.bf16 %v1740_v34, %v1739_v6  ;;  %v3148_v6 = vld [vmem:[#allocation2] sm:$0xff] }
 0xb0d   : > { %3104 = vrcp.f32 %v1731_v27 }
 0xb10   : > { %v1734_v3 = vpop.xlane.xlu1 %1733  ;;  %v1746_v5 = vpop.permute.xlu0 %1745 }
 0xb11   : > { %3106 = vrcp.f32 %v1734_v3  ;;  %2895 = vmatpush3.bf16.msra.mxu1 %v1746_v5 }
 0xb12   : > { %2906 = vmatprep.subr.bf16.mxu1 %v3004_v41 }
 0xb14   : > { %v1793_v22 = vpop.permute.xlu1 %1792  ;;  %2897 = vmatmul.mubr.msk.bf16.vlgmr.msra.gmra.mxu1 %vm877_vm3, %v1743_v20  ;;  %v2974_v61 = vpop.permute.xlu0 %2973 }
 0xb15   : > { %2901 = vmatpush3.bf16.msra.mxu0 %v1793_v22  ;;  %2907 = vmatpush3.bf16.msra.mxu1 %v3004_v41  ;;  %v2976_v2 = vunpack.i.h.bf16 %v2974_v61  ;;  %v2975_v4 = vunpack.i.l.bf16 %v2974_v61  ;;  %v3150_v41 = vld [vmem:[#allocation2 + $0x8] sm:$0xff] }
 0xb16   : > { %2908 = vmatprep.subr.bf16.mxu1 %v3005_v42 }
 0xb18   : > { %v2964_v58 = vpop.permute.xlu1 %2963 }
 0xb19   : > { %2909 = vmatpush3.bf16.msra.mxu1 %v3005_v42  ;;  %v2966_v59 = vunpack.i.h.bf16 %v2964_v58  ;;  %v2965_v60 = vunpack.i.l.bf16 %v2964_v58 }
 0xb1a   : > { %v3105_v23 = vpop.eup %3104  ;;  %2910 = vmatprep.subr.bf16.mxu1 %v3006_v44 }
 0xb1b   : > { %v1741_v37 = vmul.f32 %v3105_v23, %v3097_v25  ;;  %v1888_v63 = vsel %vm877_vm3, %v3504_v52, %v2966_v59  ;;  %v1887_v1 = vsel %vm877_vm3, %v3502_v50, %v2965_v60  ;;  %v3149_v23 = vld [vmem:[#allocation2 + $0x10] sm:$0xff] }
 0xb1c   : > { %v1892_v13 = vsel %vm1891_vm6, %v1887_v1, %v2975_v4  ;;  %v1893_v45 = vsel %vm1891_vm6, %v1888_v63, %v2976_v2  ;;  %v2969_v16 = vpop.permute.xlu1 %2968 }
 0xb1d   : > { %2911 = vmatpush3.bf16.msra.mxu1 %v3006_v44  ;;  %v2971_v32 = vunpack.i.h.bf16 %v2969_v16  ;;  %v2970_v49 = vunpack.i.l.bf16 %v2969_v16  ;;  %v3013_v16 = vld [vmem:[%s3354_s28 + $0x24] ss:$8 sps:$4 sm:$0xff]  }
 0xb1e   : > { %v3107_v35 = vpop.eup %3106  ;;  %2912 = vmatprep.subr.bf16.mxu1 %v3007_v51 }
 0xb1f   : > { %v1742_v38 = vmul.f32 %v3107_v35, %v3099_v28  ;;  %v1890_v21 = vsel %vm877_vm3, %v3512_v0, %v2971_v32  ;;  %v1889_v25 = vsel %vm877_vm3, %v3510_v62, %v2970_v49  ;;  %v2692_v0 = vld [vmem:[%s3812_s27] ss:$0 sm:$0xff]  ;;  %v3014_v32 = vld [vmem:[%s3354_s28 + $0x10] ss:$8 sps:$4 sm:$0xff]   ;;  %v3019_v49 = vld [vmem:[%s3354_s28 + $0x4] ss:$8 sps:$4 sm:$0xff]  }
 0xb20   : > { %v2979_v50 = vpop.permute.xlu1 %2978 }
 0xb21   : > { %v1744_v40 = vpack.c.bf16 %v1742_v38, %v1741_v37  ;;  %2913 = vmatpush3.bf16.msra.mxu1 %v3007_v51  ;;  %v2981_v17 = vunpack.i.h.bf16 %v2979_v50  ;;  %v2980_v18 = vunpack.i.l.bf16 %v2979_v50  ;;  %v3016_v50 = vld [vmem:[%s3354_s28 + $0x14] ss:$8 sps:$4 sm:$0xff]  }
 0xb23   : > { %2903 = vmatmul.mubr.msk.bf16.vlgmr.msra.gmra.mxu0 %vm877_vm3, %v1744_v40  ;;  %v1894_v29 = vsel %vm1891_vm6, %v1889_v25, %v2980_v18  ;;  %v1895_v30 = vsel %vm1891_vm6, %v1890_v21, %v2981_v17  ;;  %v3017_v17 = vld [vmem:[%s3354_s28] ss:$8 sps:$4 sm:$0xff]  }
 0xb24   : > { %2175 = vmatprep.mubr.bf16.mxu0 %v3204_v36 }
 0xbd4   : > { %v1785_v43 = vpop.f32.mrf.mxu1 }
 0xbd6   : > { %v2898_v46 = vpop.f32.mrf.mxu1 }
 0xbd8   : > { %v1788_v47 = vpop.f32.mrf.mxu1 }
 0xbd9   : > { %v2982_v48 = vpack.i.bf16 %v1788_v47, %v1785_v43  ;;  %v3151_v43 = vld [vmem:[#allocation2 + $0x18] sm:$0xff] }
 0xbda   : > { %v2899_v12 = vpop.f32.mrf.mxu1 }
 0xbdb   : > { %2983 = vrot.lane.b32.xlu0 %v2982_v48, %s3209_s23 }
 0xbe3   : > { %v1832_v53 = vpop.f32.mrf.mxu0 }
 0xbe5   : > { %v2904_v54 = vpop.f32.mrf.mxu0 }
 0xbe7   : > { %v1835_v55 = vpop.f32.mrf.mxu0 }
 0xbe8   : > { %v2987_v56 = vpack.i.bf16 %v1835_v55, %v1832_v53 }
 0xbe9   : > { %v2905_v57 = vpop.f32.mrf.mxu0 }
 0xbea   : > { %2988 = vrot.lane.b32.xlu1 %v2987_v56, %s3209_s23 }
 0xc4d   : > { %v2984_v7 = vpop.permute.xlu0 %2983 }
 0xc4e   : > { %v2986_v8 = vunpack.i.h.bf16 %v2984_v7  ;;  %v2985_v9 = vunpack.i.l.bf16 %v2984_v7 }
 0xc50   : > { %v1897_v24 = vsel %vm1896_vm7, %v1892_v13, %v2985_v9  ;;  %v1898_v15 = vsel %vm1896_vm7, %v1893_v45, %v2986_v8 }
 0xc51   : > { %v1901_v52 = vpack.c.bf16 %v1898_v15, %v1897_v24  ;;  %v3010_v24 = vld [vmem:[%s3354_s28 + $0x34] ss:$8 sps:$4 sm:$0xff]   ;;  %v3008_v15 = vld [vmem:[%s3354_s28 + $0x30] ss:$8 sps:$4 sm:$0xff]  }
 0xc52   : > { %2151 = vmatprep.subr.bf16.mxu0 %v3010_v24 }
 0xc53   : > { %2914 = vmatprep.mubr.msk.bf16.mxu1 %vm668_vm1, %v1901_v52  ;;  %2152 = vmatpush1.bf16.msra.mxu0 %v3008_v15  ;;  %v3011_v52 = vld [vmem:[%s3354_s28 + $0x20] ss:$8 sps:$4 sm:$0xff]  }
 0xc54   : > { %2153 = vmatprep.subr.bf16.mxu0 %v3013_v16 }
 0xc57   : > { %2154 = vmatpush1.bf16.msra.mxu0 %v3011_v52 }
 0xc58   : > { %2155 = vmatprep.subr.bf16.mxu0 %v3016_v50 }
 0xc5b   : > { %2156 = vmatpush1.bf16.msra.mxu0 %v3014_v32 }
 0xc5c   : > { %v2989_v19 = vpop.permute.xlu1 %2988  ;;  %2157 = vmatprep.subr.bf16.mxu0 %v3019_v49 }
 0xc5d   : > { %v2991_v26 = vunpack.i.h.bf16 %v2989_v19  ;;  %v2990_v28 = vunpack.i.l.bf16 %v2989_v19 }
 0xc5f   : > { %v1900_v31 = vsel %vm1896_vm7, %v1895_v30, %v2991_v26  ;;  %v1899_v39 = vsel %vm1896_vm7, %v1894_v29, %v2990_v28  ;;  %2158 = vmatpush1.bf16.msra.mxu0 %v3017_v17 }
 0xc60   : > { %v1902_v27 = vpack.c.bf16 %v1900_v31, %v1899_v39 }
 0xc62   : > { %2915 = vmatmul.mubr.msk.bf16.vlgmr.msra.gmra.mxu1 %vm668_vm1, %v1902_v27 }
 0xd22   : > { %v2916_v33 = vpop.f32.mrf.mxu1 }
 0xd23   : > { %v1991_v34 = vadd.f32 %v2916_v33, %v2692_v0 }
 0xd24   : > { %v1982_v62 = vpop.f32.mrf.mxu1 }
 0xd25   : > { %v1983_v3 = vadd.f32 %v2692_v0, %v1982_v62  ;;  %v3666_v35 = vadd.f32 %v3149_v23, %v1991_v34  ;;  %v2699_v34 = vld [vmem:[%s3813_s17] ss:$0 sm:$0xff] }
 0xd26   : > { %v2917_v5 = vpop.f32.mrf.mxu1  ;;  %v2700_v23 = vld [vmem:[%s629_s14] ss:$0 sm:$0xff] }
 0xd27   : > { %v3664_v20 = vadd.f32 %v3148_v6, %v1983_v3  ;;  %v1994_v37 = vadd.f32 %v2917_v5, %v2692_v0  ;;  %v2009_v47 = vsel %vm668_vm1, %v3666_v35, 0.0 }
 0xd28   : > { %v1985_v22 = vpop.f32.mrf.mxu1 }
 0xd29   : > { %v1986_v38 = vadd.f32 %v2692_v0, %v1985_v22  ;;  %v2003_v40 = vsel %vm668_vm1, %v3664_v20, 0.0  ;;  %v3672_v44 = vadd.f32 %v3151_v43, %v1994_v37 }
 0xd2a   : > { %2004 = vadd.xlane.f32.xlu0 %v2003_v40 }
 0xd2b   : > { %v3670_v42 = vadd.f32 %v3150_v41, %v1986_v38  ;;  %v2012_v48 = vsel %vm668_vm1, %v3672_v44, 0.0 }
 0xd2d   : > { %v2006_v46 = vsel %vm668_vm1, %v3670_v42, 0.0 }
 0xd2e   : > { %2007 = vadd.xlane.f32.xlu1 %v2006_v46  ;;  %2010 = vadd.xlane.f32.xlu0 %v2009_v47 }
 0xd32   : > { %2013 = vadd.xlane.f32.xlu0 %v2012_v48 }
 0xdb3   : > { %v2005_v12 = vpop.xlane.xlu0 %2004 }
 0xdb4   : > { %v2015_v51 = vmul.f32 0.015625, %v2005_v12 }
 0xdb6   : > { %v2019_v53 = vsub.f32 %v3664_v20, %v2015_v51 }
 0xdb7   : > { %v2008_v54 = vpop.xlane.xlu1 %2007  ;;  %v2011_v55 = vpop.xlane.xlu0 %2010 }
 0xdb8   : > { %v2016_v56 = vmul.f32 0.015625, %v2008_v54  ;;  %v2017_v57 = vmul.f32 0.015625, %v2011_v55  ;;  %v2023_v58 = vmul.f32 %v2019_v53, %v2019_v53  ;;  %v3020_v55 = vld [vmem:[%s3365_s2 + $0x78] sm:$0xff]  }
 0xdb9   : > { %2782 = vmatprep.subr.bf16.mxu1 %v3020_v55 }
 0xdba   : > { %v2020_v59 = vsub.f32 %v3670_v42, %v2016_v56  ;;  %v2021_v60 = vsub.f32 %v3666_v35, %v2017_v57  ;;  %v2027_v61 = vsel %vm668_vm1, %v2023_v58, 0.0  ;;  %v3021_v56 = vld [vmem:[%s3365_s2 + $0x38] sm:$0xff]   ;;  %v3022_v57 = vld [vmem:[%s3365_s2 + $0x70] sm:$0xff]  }
 0xdbb   : > { %2028 = vadd.xlane.f32.xlu0 %v2027_v61  ;;  %v2014_v63 = vpop.xlane.xlu0 %2013  ;;  %2783 = vmatpush3.bf16.msra.mxu1 %v3021_v56  ;;  %v3023_v58 = vld [vmem:[%s3365_s2 + $0x30] sm:$0xff]   ;;  %v3027_v61 = vld [vmem:[%s3365_s2 + $0x20] sm:$0xff]  }
 0xdbc   : > { %v2018_v1 = vmul.f32 0.015625, %v2014_v63  ;;  %v2024_v2 = vmul.f32 %v2020_v59, %v2020_v59  ;;  %v2025_v4 = vmul.f32 %v2021_v60, %v2021_v60  ;;  %2784 = vmatprep.subr.bf16.mxu1 %v3022_v57  ;;  %v3028_v63 = vld [vmem:[%s3365_s2 + $0x58] sm:$0xff]  }
 0xdbe   : > { %v2022_v7 = vsub.f32 %v3672_v44, %v2018_v1  ;;  %v2030_v8 = vsel %vm668_vm1, %v2024_v2, 0.0  ;;  %v2033_v9 = vsel %vm668_vm1, %v2025_v4, 0.0  ;;  %v3029_v1 = vld [vmem:[%s3365_s2 + $0x18] sm:$0xff]   ;;  %v3030_v2 = vld [vmem:[%s3365_s2 + $0x50] sm:$0xff]  }
 0xdbf   : > { %2031 = vadd.xlane.f32.xlu1 %v2030_v8  ;;  %2034 = vadd.xlane.f32.xlu0 %v2033_v9  ;;  %v3031_v4 = vld [vmem:[%s3365_s2 + $0x10] sm:$0xff]   ;;  %v3033_v8 = vld [vmem:[%s3365_s2 + $0x8] sm:$0xff]   ;;  %v3034_v9 = vld [vmem:[%s3365_s2 + $0x40] sm:$0xff]  }
 0xdc0   : > { %v2026_v13 = vmul.f32 %v2022_v7, %v2022_v7  ;;  %2785 = vmatpush3.bf16.msra.mxu1 %v3023_v58 }
 0xdc2   : > { %v2036_v45 = vsel %vm668_vm1, %v2026_v13, 0.0  ;;  %v3035_v13 = vld [vmem:[%s3365_s2] sm:$0xff]  }
 0xdc3   : > { %2037 = vadd.xlane.f32.xlu1 %v2036_v45  ;;  %v2085_v45 = vld [vmem:[%s3359_s16] sm:$0x3] }
 0xdc4   : > { %v2090_v24 = vrot.slane %v2085_v45, %v756_v11  ;;  %v2094_v15 = vrot.slane %v2085_v45, %v760_v14 }
 0xe44   : > { %v2029_v18 = vpop.xlane.xlu0 %2028 }
 0xe45   : > { %v2039_v19 = vmul.f32 0.015625, %v2029_v18 }
 0xe47   : > { %v2043_v21 = vadd.f32 1e-05, %v2039_v19 }
 0xe48   : > { %v2032_v25 = vpop.xlane.xlu1 %2031  ;;  %v2035_v26 = vpop.xlane.xlu0 %2034 }
 0xe49   : > { %3108 = vrsqrt.f32 %v2043_v21  ;;  %v2040_v28 = vmul.f32 0.015625, %v2032_v25  ;;  %v2041_v29 = vmul.f32 0.015625, %v2035_v26 }
 0xe4b   : > { %v2044_v30 = vadd.f32 1e-05, %v2040_v28  ;;  %v2045_v31 = vadd.f32 1e-05, %v2041_v29 }
 0xe4c   : > { %v2038_v39 = vpop.xlane.xlu1 %2037 }
 0xe4d   : > { %3110 = vrsqrt.f32 %v2044_v30  ;;  %v2042_v27 = vmul.f32 0.015625, %v2038_v39 }
 0xe4e   : > { %3112 = vrsqrt.f32 %v2045_v31 }
 0xe4f   : > { %v2046_v33 = vadd.f32 1e-05, %v2042_v27 }
 0xe51   : > { %3114 = vrsqrt.f32 %v2046_v33 }
 0xe56   : > { %v3109_v0 = vpop.eup %3108 }
 0xe57   : > { %v2051_v62 = vmul.f32 %v3109_v0, %v2019_v53 }
 0xe59   : > { %v2061_v6 = vmul.f32 %v2699_v34, %v2051_v62 }
 0xe5a   : > { %v3111_v3 = vpop.eup %3110 }
 0xe5b   : > { %v2052_v5 = vmul.f32 %v3111_v3, %v2020_v59  ;;  %v3113_v22 = vpop.eup %3112  ;;  %v2071_v40 = vadd.f32 %v2700_v23, %v2061_v6  ;;  %v3025_v59 = vld [vmem:[%s3365_s2 + $0x28] sm:$0xff]  }
 0xe5c   : > { %v2053_v43 = vmul.f32 %v3113_v22, %v2021_v60  ;;  %v3026_v60 = vld [vmem:[%s3365_s2 + $0x60] sm:$0xff]  }
 0xe5d   : > { %v2062_v37 = vmul.f32 %v2699_v34, %v2052_v5 }
 0xe5e   : > { %v3115_v38 = vpop.eup %3114  ;;  %v2063_v12 = vmul.f32 %v2699_v34, %v2053_v43 }
 0xe5f   : > { %v2072_v41 = vadd.f32 %v2700_v23, %v2062_v37  ;;  %v2054_v46 = vmul.f32 %v3115_v38, %v2022_v7  ;;  %v3032_v7 = vld [vmem:[%s3365_s2 + $0x48] sm:$0xff]  }
 0xe60   : > { %v2073_v53 = vadd.f32 %v2700_v23, %v2063_v12 }
 0xe61   : > { %v2075_v47 = vpack.c.bf16 %v2072_v41, %v2071_v40  ;;  %v2064_v48 = vmul.f32 %v2699_v34, %v2054_v46 }
 0xe63   : > { %2709 = vmatmul.mubr.msk.bf16.vlgmr.msra.gmra.mxu0 %vm668_vm1, %v2075_v47  ;;  %v2074_v51 = vadd.f32 %v2700_v23, %v2064_v48 }
 0xe64   : > { %2185 = vmatprep.mubr.bf16.mxu0 %v3204_v36  ;;  %v3024_v36 = vld [vmem:[%s3365_s2 + $0x68] sm:$0xff]   ;;  %s3814_s2 = sld [smem:[#allocation6_spill]] }
 0xe65   : > { %v2076_v54 = vpack.c.bf16 %v2074_v51, %v2073_v53  ;;  %2786 = vmatprep.subr.bf16.mxu1 %v3024_v36 }
 0xe66   : > { %2787 = vmatpush3.bf16.msra.mxu1 %v3025_v59 }
 0xe67   : > { %2788 = vmatprep.subr.bf16.mxu1 %v3026_v60 }
 0xe6a   : > { %2789 = vmatpush3.bf16.msra.mxu1 %v3027_v61  ;;  %s3815_s20 = sadd.s32 4294967295, %s3814_s2  }
 0xe6b   : > { %2710 = vmatmul.mubr.msk.bf16.gmra.mxu0 %vm668_vm1, %v2076_v54  ;;  %2790 = vmatprep.subr.bf16.mxu1 %v3028_v63  ;;  %p3755_p6 = scmp.eq.s32.totalorder %s3815_s20, 1 }
 0xe6e   : > { %2791 = vmatpush3.bf16.msra.mxu1 %v3029_v1 }
 0xe6f   : > { %2792 = vmatprep.subr.bf16.mxu1 %v3030_v2 }
 0xe72   : > { %2793 = vmatpush3.bf16.msra.mxu1 %v3031_v4 }
 0xe73   : > { %2794 = vmatprep.subr.bf16.mxu1 %v3032_v7 }
 0xe76   : > { %2795 = vmatpush3.bf16.msra.mxu1 %v3033_v8 }
 0xe77   : > { %2796 = vmatprep.subr.bf16.mxu1 %v3034_v9 }
 0xe7a   : > { %2797 = vmatpush3.bf16.msra.mxu1 %v3035_v13 }
 0xf23   : > { %v2177_v16 = vpop.f32.mrf.mxu0 }
 0xf24   : > { %v3730_v52 = vadd.f32 %v2177_v16, %v2090_v24 }
 0xf25   : > { %v2179_v50 = vpop.f32.mrf.mxu0 }
 0xf26   : > { %v2711_v32 = vmul.f32 -1.702, %v3730_v52  ;;  %v3733_v49 = vadd.f32 %v2179_v50, %v2094_v15 }
 0xf27   : > { %v2181_v17 = vpop.f32.mrf.mxu0 }
 0xf28   : > { %v2212_v18 = vmul.f32 1.442695, %v2711_v32  ;;  %v2712_v19 = vmul.f32 -1.702, %v3733_v49  ;;  %v2182_v21 = vadd.f32 %v2181_v17, %v2090_v24 }
 0xf29   : > { %v2183_v25 = vpop.f32.mrf.mxu0 }
 0xf2a   : > { %v2214_v26 = vmul.f32 1.442695, %v2712_v19  ;;  %v2713_v28 = vmul.f32 -1.702, %v2182_v21  ;;  %v2184_v11 = vadd.f32 %v2183_v25, %v2094_v15  ;;  %3116 = vpow2.f32 %v2212_v18 }
 0xf2b   : > { %v2187_v10 = vpop.f32.mrf.mxu0 }
 0xf2c   : > { %3118 = vpow2.f32 %v2214_v26  ;;  %v2216_v14 = vmul.f32 1.442695, %v2713_v28  ;;  %v2714_v29 = vmul.f32 -1.702, %v2184_v11  ;;  %v3736_v30 = vadd.f32 %v2187_v10, %v2090_v24 }
 0xf2d   : > { %v2189_v31 = vpop.f32.mrf.mxu0 }
 0xf2e   : > { %3120 = vpow2.f32 %v2216_v14  ;;  %v2218_v39 = vmul.f32 1.442695, %v2714_v29  ;;  %v2715_v27 = vmul.f32 -1.702, %v3736_v30  ;;  %v2190_v33 = vadd.f32 %v2189_v31, %v2094_v15 }
 0xf2f   : > { %v2191_v0 = vpop.f32.mrf.mxu0 }
 0xf30   : > { %3122 = vpow2.f32 %v2218_v39  ;;  %v2220_v62 = vmul.f32 1.442695, %v2715_v27  ;;  %v2716_v34 = vmul.f32 -1.702, %v2190_v33  ;;  %v2192_v3 = vadd.f32 %v2191_v0, %v2090_v24 }
 0xf31   : > { %v2193_v5 = vpop.f32.mrf.mxu0 }
 0xf32   : > { %v2222_v6 = vmul.f32 1.442695, %v2716_v34  ;;  %v2717_v22 = vmul.f32 -1.702, %v2192_v3  ;;  %v2194_v23 = vadd.f32 %v2193_v5, %v2094_v15  ;;  %3124 = vpow2.f32 %v2220_v62 }
 0xf34   : > { %3126 = vpow2.f32 %v2222_v6  ;;  %v2224_v37 = vmul.f32 1.442695, %v2717_v22  ;;  %v2718_v38 = vmul.f32 -1.702, %v2194_v23 }
 0xf36   : > { %3128 = vpow2.f32 %v2224_v37  ;;  %v2226_v40 = vmul.f32 1.442695, %v2718_v38 }
 0xf37   : > { %v3117_v41 = vpop.eup %3116 }
 0xf38   : > { %3130 = vpow2.f32 %v2226_v40  ;;  %v2228_v48 = vadd.f32 1.0, %v3117_v41 }
 0xf39   : > { %v3119_v43 = vpop.eup %3118 }
 0xf3a   : > { %v2229_v46 = vadd.f32 1.0, %v3119_v43 }
 0xf3b   : > { %v3121_v47 = vpop.eup %3120 }
 0xf3c   : > { %v2230_v12 = vadd.f32 1.0, %v3121_v47  ;;  %3132 = vrcp.f32 %v2229_v46 }
 0xf3d   : > { %v3123_v51 = vpop.eup %3122 }
 0xf3e   : > { %3134 = vrcp.f32 %v2230_v12  ;;  %v2231_v53 = vadd.f32 1.0, %v3123_v51 }
 0xf3f   : > { %3136 = vrcp.f32 %v2228_v48  ;;  %v3125_v54 = vpop.eup %3124 }
 0xf40   : > { %3138 = vrcp.f32 %v2231_v53  ;;  %v2232_v58 = vadd.f32 1.0, %v3125_v54 }
 0xf41   : > { %v3127_v55 = vpop.eup %3126 }
 0xf42   : > { %v2233_v56 = vadd.f32 1.0, %v3127_v55 }
 0xf43   : > { %v3129_v57 = vpop.eup %3128 }
 0xf44   : > { %v2234_v36 = vadd.f32 1.0, %v3129_v57  ;;  %3140 = vrcp.f32 %v2233_v56 }
 0xf45   : > { %v3131_v59 = vpop.eup %3130 }
 0xf46   : > { %3142 = vrcp.f32 %v2234_v36  ;;  %v2235_v60 = vadd.f32 1.0, %v3131_v59 }
 0xf47   : > { %3144 = vrcp.f32 %v2232_v58 }
 0xf48   : > { %3146 = vrcp.f32 %v2235_v60 }
 0xf49   : > { %v3133_v61 = vpop.eup %3132 }
 0xf4a   : > { %v2253_v7 = vmul.f32 %v3133_v61, %v3733_v49 }
 0xf4b   : > { %v3135_v63 = vpop.eup %3134 }
 0xf4c   : > { %v3137_v1 = vpop.eup %3136  ;;  %v2254_v4 = vmul.f32 %v3135_v63, %v2182_v21 }
 0xf4d   : > { %v3139_v2 = vpop.eup %3138  ;;  %v2252_v9 = vmul.f32 %v3137_v1, %v3730_v52  ;;  %v2719_v52 = vld [vmem:[%s646_s3] ss:$0 sm:$0xff]  ;;  %s2466_s3 = sshll.u32 %s3215_s30, 4  ;;  %s2467_s3 = int_to_ptr.vmem [resolvable:$true] %s2466_s3 }
 0xf4e   : > { %v2255_v8 = vmul.f32 %v3139_v2, %v2184_v11  ;;  %s3152_s23 = scalar_lea.vmem %s2467_s3, 512  ;;  %p3159_p10 = scmp.lt.s32.totalorder %s2467_s3, %s2467_s3 }
 0xf4f   : > { %v2260_v45 = vpack.c.bf16 %v2254_v4, %v2252_v9  ;;  %p3153_p7 = scmp.ne.s32.totalorder %s2467_s3, %s3152_s23  ;;  %p3160_p11 = scmp.lt.s32.totalorder %s3152_s23, %s3152_s23 }
 0xf50   : > { %v2261_v13 = vpack.c.bf16 %v2255_v8, %v2253_v7 }
 0xf51   : > { %v3141_v24 = vpop.eup %3140  ;;  %p3154_p8 = pnand %p3153_p7, %p3755_p6  ;;  %p3161_p12 = por %p3160_p11, %p3159_p10 }
 0xf52   : > { %2431 = vmatprep.mubr.bf16.mxu1 %v2261_v13  ;;  %v2257_v17 = vmul.f32 %v3141_v24, %v2190_v33 }
 0xf53   : > { %v3143_v15 = vpop.eup %3142  ;;  %2432 = vmatmul.mubr.bf16.vlgmr.msra.gmra.mxu1 %v2260_v45  ;;  %p3155_p9 = pneg %p3154_p8 }
 0xf54   : > { %v3145_v16 = vpop.eup %3144  ;;  %v2258_v32 = vmul.f32 %v3143_v15, %v2192_v3 }
 0xf55   : > { %v3147_v50 = vpop.eup %3146  ;;  %v2256_v19 = vmul.f32 %v3145_v16, %v3736_v30  ;;  %p3162_p13 = pnand %p3161_p12, %p3155_p9 }
 0xf56   : > { %v2259_v18 = vmul.f32 %v3147_v50, %v2194_v23 }
 0xf57   : > { %v2262_v25 = vpack.c.bf16 %v2258_v32, %v2256_v19 }
 0xf58   : > { %v2263_v21 = vpack.c.bf16 %v2259_v18, %v2257_v17 }
 0xf5a   : > { %2439 = vmatprep.mubr.bf16.mxu1 %v2263_v21 }
 0xf5b   : > { %2440 = vmatmul.mubr.bf16.gmra.mxu1 %v2262_v25 }
0x1013   : > { %v2798_v49 = vpop.f32.mrf.mxu1 }
0x1015   : > { %v2799_v26 = vpop.f32.mrf.mxu1 }
0x1016   : > { %v2800_v28 = vadd.f32 %v2799_v26, %v2798_v49 }
0x1017   : > { %v2801_v11 = vpop.f32.mrf.mxu1 }
0x1018   : > { %v2434_v10 = vadd.f32 %v2800_v28, %v2719_v52 }
0x1019   : > { %v2802_v14 = vpop.f32.mrf.mxu1 }
0x101a   : > { %v2448_v29 = vadd.f32 %v2434_v10, %v3664_v20  ;;  %v2803_v31 = vadd.f32 %v2802_v14, %v2801_v11 }
0x101b   : > { %v2804_v39 = vpop.f32.mrf.mxu1 }
0x101c   : > { %2452 = vst.msk [vmem:[#allocation2] sm:$0xff] %vm668_vm1, %v2448_v29  ;;  %v2437_v30 = vadd.f32 %v2803_v31, %v2719_v52 }
0x101d   : > { %v2805_v27 = vpop.f32.mrf.mxu1 }
0x101e   : > { %v2449_v33 = vadd.f32 %v2437_v30, %v3670_v42  ;;  %v2806_v0 = vadd.f32 %v2805_v27, %v2804_v39 }
0x101f   : > { %v2807_v62 = vpop.f32.mrf.mxu1 }
0x1020   : > { %2453 = vst.msk [vmem:[#allocation2 + $0x8] sm:$0xff] %vm668_vm1, %v2449_v33  ;;  %v2442_v34 = vadd.f32 %v2806_v0, %v2719_v52 }
0x1021   : > { %v2808_v3 = vpop.f32.mrf.mxu1 }
0x1022   : > { %v2450_v5 = vadd.f32 %v2442_v34, %v3666_v35  ;;  %v2809_v6 = vadd.f32 %v2808_v3, %v2807_v62 }
0x1024   : > { %2454 = vst.msk [vmem:[#allocation2 + $0x10] sm:$0xff] %vm668_vm1, %v2450_v5  ;;  %v2445_v20 = vadd.f32 %v2809_v6, %v2719_v52 }
0x1026   : > { %v2451_v42 = vadd.f32 %v2445_v20, %v3672_v44 }
0x1028   : > { %2455 = vst.msk [vmem:[#allocation2 + $0x18] sm:$0xff] %vm668_vm1, %v2451_v42 }
0x1029   : > { %3165 = shalt.err (!%p3162_p13)
}
0x102a   : > { %s3216_s15 = smov 128   ;;  %s3217_s13 = smov 8  }
0x102b   : > { %s3817_s25 = sld [smem:[#allocation12_spill]] }
0x1031   : > { %2919 = dma.vmem_to_hbm [thread:$0]  (%p3755_p6), %s2467_s3, 512, %s3817_s25, [#allocation3], %s3216_s15, %s3216_s15, %s3217_s13  }
0x1032   : > { %3189 = dma.done.wait (%p3755_p6), [#allocation3], 512  }
0x1033   : > { %3191 = vsyncadd (%p3755_p6), [#allocation3], 4294966784 }
0x1034 PF: > { %s3818_s18 = sld [smem:[#allocation6_spill]] }
0x1035   : > { %s3819_s25 = sld [smem:[#allocation5_spill]] }
0x1036   : > { %s3820_s26 = sld [smem:[#allocation7_spill]] }
0x103a   : > { %s24_s27 = sadd.s32 1, %s3818_s18  }
0x103b   : > { %p21_p0 = scmp.ge.s32.totalorder %s24_s27, 4  }
0x103d   :  { %23 = sbr.rel (!%p21_p0) target bundleno = 7 (0x7), region = 140 }
0x1042   :  { %2482 = vsyncpa [#allocation3], 1 }
0x1043   :  { %2484 = vsyncpa [#allocation3 + $0x1], 1 }

</bundles_post_ra>
